<compile_context>
chip_gen: v5e
topology: v5e:2x2
jax: 0.10.0
libtpu: 0.0.40
codegen_flags: <defaults>
</compile_context>

<pallas_src>
import functools

import jax
import jax.numpy as jnp
from jax import lax
from jax.experimental import pallas as pl
from jax.experimental.pallas import tpu as pltpu


# ---------------------------------------------------------------------------
# Weight preparation: fold a 3x3 / pad=1 conv (and the following BatchNorm
# scale) into a banded matrix acting on lane-dense (rows, W*Cin) activations.
# ---------------------------------------------------------------------------
def _banded_conv3x3_weights(w_hwio, W, scale=None, dtype=jnp.bfloat16):
    """(3, 3, Cin, Cout) HWIO -> (3*W*Cin, W*Cout) banded matrix.

    For activations a[r, w*Cin + ci] the conv becomes
        out[r] = a[r-1] @ A[0:WC] + a[r] @ A[WC:2WC] + a[r+1] @ A[2WC:3WC]
    (rows r-1 / r+1 replaced by zeros at the image border).  W-boundary zero
    padding is encoded by omitting the out-of-range bands.  If `scale` (Cout,)
    is given, it is folded into the output columns in f32 before the cast.
    """
    _, _, Cin, Cout = w_hwio.shape
    blocks = []
    for kh in range(3):
        a = jnp.zeros((W * Cin, W * Cout), jnp.float32)
        for kw in range(3):
            # shift[v, w] = 1  iff  input column v == output column w + kw - 1
            shift = jnp.eye(W, k=1 - kw, dtype=jnp.float32)
            a = a + jnp.kron(shift, w_hwio[kh, kw].astype(jnp.float32))
        blocks.append(a)
    a_full = jnp.concatenate(blocks, axis=0)              # (3*W*Cin, W*Cout) f32
    if scale is not None:
        a_full = a_full * jnp.tile(scale.astype(jnp.float32), W)[None, :]
    return a_full.astype(dtype)


# ---------------------------------------------------------------------------
# Kernel
# ---------------------------------------------------------------------------
def _conv3x3_banded(x_f32, a_ref, H):
    """3x3 SAME conv on lane-dense rows via three banded MXU dots.

    x_f32: (M, W*C) f32 with M = TB*H rows of TB stacked images.
    a_ref: (3*W*C, W*C) bf16 banded weights (BN scale folded in).
    Returns (M, W*C) f32.
    """
    M, WC = x_f32.shape
    row = lax.broadcasted_iota(jnp.int32, (M, 1), 0)
    # Image rows h-1 / h+1 via circular rolls (XLU); per-image borders are
    # zeroed by the masks, which also kills the cross-image rows introduced by
    # folding the batch into M.
    x_prev = jnp.where(row % H == 0, 0.0, pltpu.roll(x_f32, shift=1, axis=0))
    x_next = jnp.where(row % H == H - 1, 0.0,
                       pltpu.roll(x_f32, shift=M - 1, axis=0))

    acc = jnp.dot(x_prev.astype(jnp.bfloat16), a_ref[pl.ds(0 * WC, WC), :],
                  preferred_element_type=jnp.float32)
    acc += jnp.dot(x_f32.astype(jnp.bfloat16), a_ref[pl.ds(1 * WC, WC), :],
                   preferred_element_type=jnp.float32)
    acc += jnp.dot(x_next.astype(jnp.bfloat16), a_ref[pl.ds(2 * WC, WC), :],
                   preferred_element_type=jnp.float32)
    return acc


def _basic_block_kernel(x_ref, a1_ref, b1_ref, a2_ref, b2_ref, o_ref, *, H):
    # x_ref : (TB*H, W*C)   f32 lane-dense activations (TB stacked images)
    # a*_ref: (3*W*C, W*C)  bf16 banded conv weights with BN scale folded in
    # b*_ref: (1, W*C)      f32 folded BN bias (tiled across W)
    # o_ref : (TB*H, W*C)   f32
    x = x_ref[...]                                      # (M, W*C) f32

    # conv1 (* bn1 scale folded) -> + bn1 bias -> relu
    y1 = _conv3x3_banded(x, a1_ref, H)
    h1 = jnp.maximum(y1 + b1_ref[...], 0.0)

    # conv2 (* bn2 scale folded) -> + bn2 bias -> + identity -> relu
    y2 = _conv3x3_banded(h1, a2_ref, H)
    o_ref[...] = jnp.maximum(y2 + b2_ref[...] + x, 0.0)


# ---------------------------------------------------------------------------
# Wrapper
# ---------------------------------------------------------------------------
def _pick_batch_tile(B, H):
    """Batch tile TB (divisor of B): prefer TB*H >= 256 rows (fills MXU rows on
    v6e/v7x) with >= 2 grid steps (v7x has 2 TensorCores), then >= 128 rows,
    else fall back to the whole batch."""
    divisors = [d for d in range(1, B + 1) if B % d == 0 and (d * H) % 8 == 0]
    for target, min_steps in ((256, 2), (128, 2), (256, 1), (128, 1)):
        for d in divisors:
            if d * H >= target and (B // d) >= min_steps:
                return d
    return B


def basic_block_pallas(x_nhwc, w1, scale1, bias1, w2, scale2, bias2):
    """Fused BasicBlock forward (stride=1, downsample=None, eval-mode BN).

    x_nhwc: (B, H, W, Cin) f32.  w1/w2: (3, 3, Cin, Cout) HWIO conv weights.
    scale*/bias*: (Cout,) folded eval-mode BatchNorm.  Returns (B, H, W, Cout).
    """
    B, H, W, Cin = x_nhwc.shape
    Cout = w1.shape[-1]
    assert Cin == Cout, "BasicBlock with downsample=None requires inplanes == planes"
    WC = W * Cin

    TB = _pick_batch_tile(B, H)
    assert B % TB == 0

    # Lane-dense view with batch folded into the row (M) axis.  Pure layout
    # plumbing in the wrapper, not compute.
    x_rows = x_nhwc.reshape(B * H, WC)

    # Banded conv weights with BN scale folded in (f32 fold, then bf16 cast).
    a1 = _banded_conv3x3_weights(w1, W, scale=scale1)    # (3*WC, WC) bf16
    a2 = _banded_conv3x3_weights(w2, W, scale=scale2)    # (3*WC, WC) bf16

    # Per-channel BN bias tiled across W so it broadcasts in (M, W*C).
    b1 = jnp.tile(bias1, W).reshape(1, WC).astype(jnp.float32)
    b2 = jnp.tile(bias2, W).reshape(1, WC).astype(jnp.float32)

    full = lambda shape: pl.BlockSpec(shape, lambda b: (0,) * len(shape))

    out_rows = pl.pallas_call(
        functools.partial(_basic_block_kernel, H=H),
        out_shape=jax.ShapeDtypeStruct((B * H, WC), jnp.float32),
        grid_spec=pltpu.PrefetchScalarGridSpec(
            num_scalar_prefetch=0,
            grid=(B // TB,),
            in_specs=[
                pl.BlockSpec((TB * H, WC), lambda b: (b, 0)),  # activations
                full((3 * WC, WC)),                            # banded conv1 (+bn1 scale)
                full((1, WC)),                                 # bn1 bias
                full((3 * WC, WC)),                            # banded conv2 (+bn2 scale)
                full((1, WC)),                                 # bn2 bias
            ],
            out_specs=pl.BlockSpec((TB * H, WC), lambda b: (b, 0)),
        ),
        compiler_params=pltpu.CompilerParams(
            dimension_semantics=("parallel",)),
    )(x_rows, a1, b1, a2, b2)

    return out_rows.reshape(B, H, W, Cout)


# ---------------------------------------------------------------------------
# Reference + BN folding
# ---------------------------------------------------------------------------
def _reference(x_nhwc, w1, s1, b1, w2, s2, b2, mxu_dtype=jnp.float32):
    """Plain-JAX reference (NHWC / HWIO).  mxu_dtype=bfloat16 mirrors the
    kernel numerics (bf16 conv inputs, f32 accumulation / elementwise)."""
    dn = lax.conv_dimension_numbers(x_nhwc.shape, w1.shape,
                                    ("NHWC", "HWIO", "NHWC"))

    def conv(x, w):
        return lax.conv_general_dilated(
            x.astype(mxu_dtype), w.astype(mxu_dtype), (1, 1), "SAME",
            dimension_numbers=dn, preferred_element_type=jnp.float32)

    out = jnp.maximum(conv(x_nhwc, w1) * s1 + b1, 0.0)
    out = conv(out, w2) * s2 + b2 + x_nhwc
    return jnp.maximum(out, 0.0)


def _fold_bn(gamma, beta, mean, var, eps=1e-5):
    scale = gamma / jnp.sqrt(var + eps)
    bias = beta - mean * scale
    return scale, bias


if __name__ == "__main__":
    key = jax.random.PRNGKey(0)
    # inplanes = planes = 8, stride=1, downsample=None.
    # B=32 so the batch-into-M tiling gives TB=16 -> M=256 rows per MXU pass
    # and a 2-step parallel grid (both v7x TensorCores).
    B, C, H, W = 32, 8, 16, 16

    ks = jax.random.split(key, 10)
    # Input created in PyTorch-style NCHW, converted to NHWC for the kernel.
    x_nchw = jax.random.normal(ks[0], (B, C, H, W), jnp.float32)
    x_nhwc = jnp.transpose(x_nchw, (0, 2, 3, 1))

    # conv weights: HWIO layout (equivalent to PyTorch OIHW, transposed).
    w1 = jax.random.normal(ks[1], (3, 3, C, C), jnp.float32) * 0.1
    w2 = jax.random.normal(ks[2], (3, 3, C, C), jnp.float32) * 0.1

    # BatchNorm (eval-mode) parameters, folded to per-channel scale/bias.
    g1 = 1.0 + 0.1 * jax.random.normal(ks[3], (C,), jnp.float32)
    be1 = 0.1 * jax.random.normal(ks[4], (C,), jnp.float32)
    m1 = 0.1 * jax.random.normal(ks[5], (C,), jnp.float32)
    v1 = jnp.abs(jax.random.normal(ks[6], (C,), jnp.float32)) + 0.5
    g2 = 1.0 + 0.1 * jax.random.normal(ks[7], (C,), jnp.float32)
    be2 = 0.1 * jax.random.normal(ks[8], (C,), jnp.float32)
    m2 = 0.05 * jax.random.normal(ks[9], (C,), jnp.float32)
    v2 = jnp.ones((C,), jnp.float32)
    s1, b1 = _fold_bn(g1, be1, m1, v1)
    s2, b2 = _fold_bn(g2, be2, m2, v2)

    out = basic_block_pallas(x_nhwc, w1, s1, b1, w2, s2, b2)
    out = jax.block_until_ready(out)
    assert out.shape == (B, H, W, C)

    # Check against a reference that mirrors the kernel's numerics (bf16 MXU
    # inputs, f32 accumulation; tolerance covers accumulation-order, the
    # scale-into-weight fold, and bf16 double-rounding of the intermediate).
    ref_bf16 = _reference(x_nhwc, w1, s1, b1, w2, s2, b2, mxu_dtype=jnp.bfloat16)
    assert jnp.allclose(out, ref_bf16, atol=2e-2, rtol=2e-2), "mismatch vs bf16 reference"

    # Sanity check against the pure-f32 reference (looser: bf16 quantization).
    ref_f32 = _reference(x_nhwc, w1, s1, b1, w2, s2, b2, mxu_dtype=jnp.float32)
    assert jnp.allclose(out, ref_f32, atol=5e-2, rtol=5e-2), "mismatch vs f32 reference"

    print("KERNEL_OK")
</pallas_src>

<mosaic_0001>
module attributes {stable_mosaic.version = 11 : i64} {
  func.func @_basic_block_kernel(%arg0: i32, %arg1: memref<256x128xf32, #tpu.memory_space<vmem>>, %arg2: memref<384x128xbf16, #tpu.memory_space<vmem>>, %arg3: memref<1x128xf32, #tpu.memory_space<vmem>>, %arg4: memref<384x128xbf16, #tpu.memory_space<vmem>>, %arg5: memref<1x128xf32, #tpu.memory_space<vmem>>, %arg6: memref<256x128xf32, #tpu.memory_space<vmem>>) attributes {dimension_semantics = [#tpu.dimension_semantics<parallel>], iteration_bounds = array<i64: 2>, scalar_prefetch = 0 : i64, scratch_operands = 0 : i64, tpu.core_type = #tpu.core_type<tc>, window_params = [{transform_indices = @transform_0, window_bounds = array<i64: 256, 128>}, {pipeline_mode = #tpu.pipeline_mode<synchronous>, transform_indices = @transform_1, window_bounds = array<i64: 384, 128>}, {pipeline_mode = #tpu.pipeline_mode<synchronous>, transform_indices = @transform_2, window_bounds = array<i64: 1, 128>}, {pipeline_mode = #tpu.pipeline_mode<synchronous>, transform_indices = @transform_3, window_bounds = array<i64: 384, 128>}, {pipeline_mode = #tpu.pipeline_mode<synchronous>, transform_indices = @transform_4, window_bounds = array<i64: 1, 128>}, {transform_indices = @transform_5, window_bounds = array<i64: 256, 128>}]} {
    %c0 = arith.constant 0 : index
    %c0_0 = arith.constant 0 : index
    %0 = vector.load %arg1[%c0, %c0_0] : memref<256x128xf32, #tpu.memory_space<vmem>>, vector<256x128xf32>
    %1 = tpu.iota {dimensions = array<i32: 0>} : vector<256x1xi32>
    %c16_i32 = arith.constant 16 : i32
    %c0_i32 = arith.constant 0 : i32
    %2 = arith.cmpi eq, %c16_i32, %c0_i32 : i32
    %c1_i32 = arith.constant 1 : i32
    %3 = arith.select %2, %c1_i32, %c16_i32 : i32
    %4 = vector.broadcast %3 : i32 to vector<256x1xi32>
    %5 = arith.remsi %1, %4 : vector<256x1xi32>
    %c0_i32_1 = arith.constant 0 : i32
    %6 = vector.broadcast %c0_i32_1 : i32 to vector<256x1xi32>
    %7 = arith.cmpi ne, %5, %6 : vector<256x1xi32>
    %c0_i32_2 = arith.constant 0 : i32
    %8 = vector.broadcast %c0_i32_2 : i32 to vector<256x1xi32>
    %9 = arith.cmpi slt, %5, %8 : vector<256x1xi32>
    %c0_i32_3 = arith.constant 0 : i32
    %10 = arith.cmpi slt, %3, %c0_i32_3 : i32
    %11 = vector.broadcast %10 : i1 to vector<256x1xi1>
    %12 = vector.broadcast %11 : vector<256x1xi1> to vector<256x1xi1>
    %13 = arith.xori %9, %12 : vector<256x1xi1>
    %14 = arith.andi %13, %7 : vector<256x1xi1>
    %15 = vector.broadcast %3 : i32 to vector<256x1xi32>
    %16 = arith.addi %5, %15 : vector<256x1xi32>
    %17 = arith.select %14, %16, %5 : vector<256x1xi1>, vector<256x1xi32>
    %c0_i32_4 = arith.constant 0 : i32
    %18 = vector.broadcast %c0_i32_4 : i32 to vector<256x1xi32>
    %19 = arith.cmpi eq, %17, %18 : vector<256x1xi32>
    %c1_i32_5 = arith.constant 1 : i32
    %20 = tpu.dynamic_rotate %0 by %c1_i32_5 dim 0 : vector<256x128xf32>, i32 -> vector<256x128xf32>
    %cst = arith.constant 0.000000e+00 : f32
    %21 = vector.shape_cast %19 : vector<256x1xi1> to vector<256x1xi1>
    %22 = vector.broadcast %21 : vector<256x1xi1> to vector<256x128xi1>
    %23 = vector.broadcast %cst : f32 to vector<256x128xf32>
    %24 = arith.select %22, %23, %20 : vector<256x128xi1>, vector<256x128xf32>
    %c16_i32_6 = arith.constant 16 : i32
    %c0_i32_7 = arith.constant 0 : i32
    %25 = arith.cmpi eq, %c16_i32_6, %c0_i32_7 : i32
    %c1_i32_8 = arith.constant 1 : i32
    %26 = arith.select %25, %c1_i32_8, %c16_i32_6 : i32
    %27 = vector.broadcast %26 : i32 to vector<256x1xi32>
    %28 = arith.remsi %1, %27 : vector<256x1xi32>
    %c0_i32_9 = arith.constant 0 : i32
    %29 = vector.broadcast %c0_i32_9 : i32 to vector<256x1xi32>
    %30 = arith.cmpi ne, %28, %29 : vector<256x1xi32>
    %c0_i32_10 = arith.constant 0 : i32
    %31 = vector.broadcast %c0_i32_10 : i32 to vector<256x1xi32>
    %32 = arith.cmpi slt, %28, %31 : vector<256x1xi32>
    %c0_i32_11 = arith.constant 0 : i32
    %33 = arith.cmpi slt, %26, %c0_i32_11 : i32
    %34 = vector.broadcast %33 : i1 to vector<256x1xi1>
    %35 = vector.broadcast %34 : vector<256x1xi1> to vector<256x1xi1>
    %36 = arith.xori %32, %35 : vector<256x1xi1>
    %37 = arith.andi %36, %30 : vector<256x1xi1>
    %38 = vector.broadcast %26 : i32 to vector<256x1xi32>
    %39 = arith.addi %28, %38 : vector<256x1xi32>
    %40 = arith.select %37, %39, %28 : vector<256x1xi1>, vector<256x1xi32>
    %c15_i32 = arith.constant 15 : i32
    %41 = vector.broadcast %c15_i32 : i32 to vector<256x1xi32>
    %42 = arith.cmpi eq, %40, %41 : vector<256x1xi32>
    %c255_i32 = arith.constant 255 : i32
    %43 = tpu.dynamic_rotate %0 by %c255_i32 dim 0 : vector<256x128xf32>, i32 -> vector<256x128xf32>
    %cst_12 = arith.constant 0.000000e+00 : f32
    %44 = vector.shape_cast %42 : vector<256x1xi1> to vector<256x1xi1>
    %45 = vector.broadcast %44 : vector<256x1xi1> to vector<256x128xi1>
    %46 = vector.broadcast %cst_12 : f32 to vector<256x128xf32>
    %47 = arith.select %45, %46, %43 : vector<256x128xi1>, vector<256x128xf32>
    %48 = arith.truncf %24 : vector<256x128xf32> to vector<256x128xbf16>
    %c0_13 = arith.constant 0 : index
    %c0_14 = arith.constant 0 : index
    %49 = vector.load %arg2[%c0_13, %c0_14] : memref<384x128xbf16, #tpu.memory_space<vmem>>, vector<128x128xbf16>
    %cst_15 = arith.constant dense<0.000000e+00> : vector<256x128xf32>
    %50 = tpu.matmul %48, %49, %cst_15 {dimension_numbers = #tpu.dot_dimension_numbers<[1], [0], [0], [1], [0, 0, 1, 1], [], []>} : vector<256x128xbf16>, vector<128x128xbf16>, vector<256x128xf32> -> vector<256x128xf32>
    %51 = arith.truncf %0 : vector<256x128xf32> to vector<256x128xbf16>
    %c128 = arith.constant 128 : index
    %c0_16 = arith.constant 0 : index
    %52 = vector.load %arg2[%c128, %c0_16] : memref<384x128xbf16, #tpu.memory_space<vmem>>, vector<128x128xbf16>
    %cst_17 = arith.constant dense<0.000000e+00> : vector<256x128xf32>
    %53 = tpu.matmul %51, %52, %cst_17 {dimension_numbers = #tpu.dot_dimension_numbers<[1], [0], [0], [1], [0, 0, 1, 1], [], []>} : vector<256x128xbf16>, vector<128x128xbf16>, vector<256x128xf32> -> vector<256x128xf32>
    %54 = arith.addf %50, %53 : vector<256x128xf32>
    %55 = arith.truncf %47 : vector<256x128xf32> to vector<256x128xbf16>
    %c256 = arith.constant 256 : index
    %c0_18 = arith.constant 0 : index
    %56 = vector.load %arg2[%c256, %c0_18] : memref<384x128xbf16, #tpu.memory_space<vmem>>, vector<128x128xbf16>
    %cst_19 = arith.constant dense<0.000000e+00> : vector<256x128xf32>
    %57 = tpu.matmul %55, %56, %cst_19 {dimension_numbers = #tpu.dot_dimension_numbers<[1], [0], [0], [1], [0, 0, 1, 1], [], []>} : vector<256x128xbf16>, vector<128x128xbf16>, vector<256x128xf32> -> vector<256x128xf32>
    %58 = arith.addf %54, %57 : vector<256x128xf32>
    %c0_20 = arith.constant 0 : index
    %c0_21 = arith.constant 0 : index
    %59 = vector.load %arg3[%c0_20, %c0_21] : memref<1x128xf32, #tpu.memory_space<vmem>>, vector<1x128xf32>
    %60 = vector.broadcast %59 : vector<1x128xf32> to vector<256x128xf32>
    %61 = arith.addf %58, %60 : vector<256x128xf32>
    %cst_22 = arith.constant 0.000000e+00 : f32
    %62 = vector.broadcast %cst_22 : f32 to vector<256x128xf32>
    %63 = arith.maximumf %61, %62 : vector<256x128xf32>
    %64 = tpu.iota {dimensions = array<i32: 0>} : vector<256x1xi32>
    %c16_i32_23 = arith.constant 16 : i32
    %c0_i32_24 = arith.constant 0 : i32
    %65 = arith.cmpi eq, %c16_i32_23, %c0_i32_24 : i32
    %c1_i32_25 = arith.constant 1 : i32
    %66 = arith.select %65, %c1_i32_25, %c16_i32_23 : i32
    %67 = vector.broadcast %66 : i32 to vector<256x1xi32>
    %68 = arith.remsi %64, %67 : vector<256x1xi32>
    %c0_i32_26 = arith.constant 0 : i32
    %69 = vector.broadcast %c0_i32_26 : i32 to vector<256x1xi32>
    %70 = arith.cmpi ne, %68, %69 : vector<256x1xi32>
    %c0_i32_27 = arith.constant 0 : i32
    %71 = vector.broadcast %c0_i32_27 : i32 to vector<256x1xi32>
    %72 = arith.cmpi slt, %68, %71 : vector<256x1xi32>
    %c0_i32_28 = arith.constant 0 : i32
    %73 = arith.cmpi slt, %66, %c0_i32_28 : i32
    %74 = vector.broadcast %73 : i1 to vector<256x1xi1>
    %75 = vector.broadcast %74 : vector<256x1xi1> to vector<256x1xi1>
    %76 = arith.xori %72, %75 : vector<256x1xi1>
    %77 = arith.andi %76, %70 : vector<256x1xi1>
    %78 = vector.broadcast %66 : i32 to vector<256x1xi32>
    %79 = arith.addi %68, %78 : vector<256x1xi32>
    %80 = arith.select %77, %79, %68 : vector<256x1xi1>, vector<256x1xi32>
    %c0_i32_29 = arith.constant 0 : i32
    %81 = vector.broadcast %c0_i32_29 : i32 to vector<256x1xi32>
    %82 = arith.cmpi eq, %80, %81 : vector<256x1xi32>
    %c1_i32_30 = arith.constant 1 : i32
    %83 = tpu.dynamic_rotate %63 by %c1_i32_30 dim 0 : vector<256x128xf32>, i32 -> vector<256x128xf32>
    %cst_31 = arith.constant 0.000000e+00 : f32
    %84 = vector.shape_cast %82 : vector<256x1xi1> to vector<256x1xi1>
    %85 = vector.broadcast %84 : vector<256x1xi1> to vector<256x128xi1>
    %86 = vector.broadcast %cst_31 : f32 to vector<256x128xf32>
    %87 = arith.select %85, %86, %83 : vector<256x128xi1>, vector<256x128xf32>
    %c16_i32_32 = arith.constant 16 : i32
    %c0_i32_33 = arith.constant 0 : i32
    %88 = arith.cmpi eq, %c16_i32_32, %c0_i32_33 : i32
    %c1_i32_34 = arith.constant 1 : i32
    %89 = arith.select %88, %c1_i32_34, %c16_i32_32 : i32
    %90 = vector.broadcast %89 : i32 to vector<256x1xi32>
    %91 = arith.remsi %64, %90 : vector<256x1xi32>
    %c0_i32_35 = arith.constant 0 : i32
    %92 = vector.broadcast %c0_i32_35 : i32 to vector<256x1xi32>
    %93 = arith.cmpi ne, %91, %92 : vector<256x1xi32>
    %c0_i32_36 = arith.constant 0 : i32
    %94 = vector.broadcast %c0_i32_36 : i32 to vector<256x1xi32>
    %95 = arith.cmpi slt, %91, %94 : vector<256x1xi32>
    %c0_i32_37 = arith.constant 0 : i32
    %96 = arith.cmpi slt, %89, %c0_i32_37 : i32
    %97 = vector.broadcast %96 : i1 to vector<256x1xi1>
    %98 = vector.broadcast %97 : vector<256x1xi1> to vector<256x1xi1>
    %99 = arith.xori %95, %98 : vector<256x1xi1>
    %100 = arith.andi %99, %93 : vector<256x1xi1>
    %101 = vector.broadcast %89 : i32 to vector<256x1xi32>
    %102 = arith.addi %91, %101 : vector<256x1xi32>
    %103 = arith.select %100, %102, %91 : vector<256x1xi1>, vector<256x1xi32>
    %c15_i32_38 = arith.constant 15 : i32
    %104 = vector.broadcast %c15_i32_38 : i32 to vector<256x1xi32>
    %105 = arith.cmpi eq, %103, %104 : vector<256x1xi32>
    %c255_i32_39 = arith.constant 255 : i32
    %106 = tpu.dynamic_rotate %63 by %c255_i32_39 dim 0 : vector<256x128xf32>, i32 -> vector<256x128xf32>
    %cst_40 = arith.constant 0.000000e+00 : f32
    %107 = vector.shape_cast %105 : vector<256x1xi1> to vector<256x1xi1>
    %108 = vector.broadcast %107 : vector<256x1xi1> to vector<256x128xi1>
    %109 = vector.broadcast %cst_40 : f32 to vector<256x128xf32>
    %110 = arith.select %108, %109, %106 : vector<256x128xi1>, vector<256x128xf32>
    %111 = arith.truncf %87 : vector<256x128xf32> to vector<256x128xbf16>
    %c0_41 = arith.constant 0 : index
    %c0_42 = arith.constant 0 : index
    %112 = vector.load %arg4[%c0_41, %c0_42] : memref<384x128xbf16, #tpu.memory_space<vmem>>, vector<128x128xbf16>
    %cst_43 = arith.constant dense<0.000000e+00> : vector<256x128xf32>
    %113 = tpu.matmul %111, %112, %cst_43 {dimension_numbers = #tpu.dot_dimension_numbers<[1], [0], [0], [1], [0, 0, 1, 1], [], []>} : vector<256x128xbf16>, vector<128x128xbf16>, vector<256x128xf32> -> vector<256x128xf32>
    %114 = arith.truncf %63 : vector<256x128xf32> to vector<256x128xbf16>
    %c128_44 = arith.constant 128 : index
    %c0_45 = arith.constant 0 : index
    %115 = vector.load %arg4[%c128_44, %c0_45] : memref<384x128xbf16, #tpu.memory_space<vmem>>, vector<128x128xbf16>
    %cst_46 = arith.constant dense<0.000000e+00> : vector<256x128xf32>
    %116 = tpu.matmul %114, %115, %cst_46 {dimension_numbers = #tpu.dot_dimension_numbers<[1], [0], [0], [1], [0, 0, 1, 1], [], []>} : vector<256x128xbf16>, vector<128x128xbf16>, vector<256x128xf32> -> vector<256x128xf32>
    %117 = arith.addf %113, %116 : vector<256x128xf32>
    %118 = arith.truncf %110 : vector<256x128xf32> to vector<256x128xbf16>
    %c256_47 = arith.constant 256 : index
    %c0_48 = arith.constant 0 : index
    %119 = vector.load %arg4[%c256_47, %c0_48] : memref<384x128xbf16, #tpu.memory_space<vmem>>, vector<128x128xbf16>
    %cst_49 = arith.constant dense<0.000000e+00> : vector<256x128xf32>
    %120 = tpu.matmul %118, %119, %cst_49 {dimension_numbers = #tpu.dot_dimension_numbers<[1], [0], [0], [1], [0, 0, 1, 1], [], []>} : vector<256x128xbf16>, vector<128x128xbf16>, vector<256x128xf32> -> vector<256x128xf32>
    %121 = arith.addf %117, %120 : vector<256x128xf32>
    %c0_50 = arith.constant 0 : index
    %c0_51 = arith.constant 0 : index
    %122 = vector.load %arg5[%c0_50, %c0_51] : memref<1x128xf32, #tpu.memory_space<vmem>>, vector<1x128xf32>
    %123 = vector.broadcast %122 : vector<1x128xf32> to vector<256x128xf32>
    %124 = arith.addf %121, %123 : vector<256x128xf32>
    %125 = arith.addf %124, %0 : vector<256x128xf32>
    %cst_52 = arith.constant 0.000000e+00 : f32
    %126 = vector.broadcast %cst_52 : f32 to vector<256x128xf32>
    %127 = arith.maximumf %125, %126 : vector<256x128xf32>
    %c0_53 = arith.constant 0 : index
    %c0_54 = arith.constant 0 : index
    %128 = vector.load %arg6[%c0_53, %c0_54] : memref<256x128xf32, #tpu.memory_space<vmem>>, vector<256x128xf32>
    tpu.vector_store %arg6[%c0_53, %c0_54], %127 {strides = array<i32>} : memref<256x128xf32, #tpu.memory_space<vmem>>, vector<256x128xf32>,
    return
  }
  func.func @transform_0(%arg0: i32) -> (i32, i32) {
    %c0_i32 = arith.constant 0 : i32
    %c0_i32_0 = arith.constant 0 : i32
    return %arg0, %c0_i32 : i32, i32
  }
  func.func @transform_1(%arg0: i32) -> (i32, i32) {
    %c0_i32 = arith.constant 0 : i32
    %c0_i32_0 = arith.constant 0 : i32
    %c0_i32_1 = arith.constant 0 : i32
    return %c0_i32, %c0_i32_0 : i32, i32
  }
  func.func @transform_2(%arg0: i32) -> (i32, i32) {
    %c0_i32 = arith.constant 0 : i32
    %c0_i32_0 = arith.constant 0 : i32
    %c0_i32_1 = arith.constant 0 : i32
    return %c0_i32, %c0_i32_0 : i32, i32
  }
  func.func @transform_3(%arg0: i32) -> (i32, i32) {
    %c0_i32 = arith.constant 0 : i32
    %c0_i32_0 = arith.constant 0 : i32
    %c0_i32_1 = arith.constant 0 : i32
    return %c0_i32, %c0_i32_0 : i32, i32
  }
  func.func @transform_4(%arg0: i32) -> (i32, i32) {
    %c0_i32 = arith.constant 0 : i32
    %c0_i32_0 = arith.constant 0 : i32
    %c0_i32_1 = arith.constant 0 : i32
    return %c0_i32, %c0_i32_0 : i32, i32
  }
  func.func @transform_5(%arg0: i32) -> (i32, i32) {
    %c0_i32 = arith.constant 0 : i32
    %c0_i32_0 = arith.constant 0 : i32
    return %arg0, %c0_i32 : i32, i32
  }
}

</mosaic_0001>

<bundles_post_ra>
// kernel: tpu_custom_call.1
= control target key start
LH: loop header
LB: loop body
LE: loop exit
PB: predicated region body
PF: predicated region fallthrough
CT: control target
= control target key end

     0   :  { %10 = vsyncpa [#allocation3], 0  ;;  %s4859_s0 = inlined_call_operand.hbm [shape: f32[512,128], index: 0, kind: input, shape index: {}]   ;;  %s4860_s1 = inlined_call_operand.hbm [shape: bf16[384,128], index: 1, kind: input, shape index: {}]   ;;  %s4861_s2 = inlined_call_operand.vmem [shape: f32[1,128], index: 2, kind: input, shape index: {}]   ;;  %s4862_s3 = inlined_call_operand.hbm [shape: bf16[384,128], index: 3, kind: input, shape index: {}]   ;;  %s4863_s4 = inlined_call_operand.vmem [shape: f32[1,128], index: 4, kind: input, shape index: {}]   ;;  %s4864_s5 = inlined_call_operand.hbm [shape: f32[512,128], index: 5, kind: output, shape index: {}]  }
   0x1   :  { %12 = vsyncpa [#allocation3 + $0x1], 0 }
   0x2   :  { %13 = vsyncpa [#allocation6], 0 }
   0x3   :  { %14 = vsyncpa [#allocation4], 0 }
   0x4   :  { %16 = vsyncpa [#allocation4 + $0x1], 0  ;;  %s3566_s18 = smov 0   ;;  %s3568_s19 = smov 0  }
   0x5   :  { %s3570_s20 = smov 0   ;;  %s3572_s21 = smov 0  }
   0x6 LB: > { %s3587_s22 = sadd.s32 4294967295, %s3525_s21   ;;  %s2693_s23 = sadd.s32 4294967294, %s3525_s21   ;;  %s3525_s21 = sphi %s3572_s21, %s5151_s21   ;;  %s3521_s20 = sphi %s3570_s20, %s5150_s20   ;;  %s3517_s19 = sphi %s3568_s19, %s5149_s19   ;;  %s3513_s18 = sphi %s3566_s18, %s5148_s18  }
   0x7   : > { %p42_p0 = scmp.ne.s32.totalorder %s3517_s19, %s3513_s18  ;;  %p43_p1 = scmp.eq.s32.totalorder %s3587_s22, 0 }
   0x8   : > { %p150_p2 = scmp.eq.s32.totalorder %s3587_s22, 1  ;;  %p156_p3 = scmp.eq.s32.totalorder %s2693_s23, 1 }
   0x9   : > { %p3596_p4 = por %p43_p1, %p42_p0  ;;  %p2694_p5 = scmp.ge.s32.totalorder %s3525_s21, 1 }
   0xa   : > { %p3601_p6 = por %p156_p3, %p42_p0  ;;  %p163_p7 = scmp.lt.s32.totalorder %s3525_s21, 3 }
   0xb   : > { %s174_s28 = sshll.u32 %s4860_s1, 4  ;;  %s3527_s30 = smov [#allocation5]   ;;  %s175_s28 = int_to_ptr.hbm [resolvable:$true] %s174_s28 }
   0xc   : > { %p3609_p8 = pnand %p2694_p5, %p163_p7  ;;  %s176_s6 = sshll.u32 %s3527_s30, 4  ;;  %s177_s6 = int_to_ptr.vmem [resolvable:$true] %s176_s6 }
   0xd   : > { %s191_s9 = sshll.u32 %s4862_s3, 4  ;;  %s3528_s10 = smov 64   ;;  %s192_s9 = int_to_ptr.hbm [resolvable:$true] %s191_s9 }
   0xe   : > { %p3269_p9 = pneg %p3609_p8  ;;  %s3529_s11 = smov 4  }
   0xf   : > { %s3530_s12 = smov [#allocation7]   ;;  %s3622_s14 = sadd.s32 1, %s3525_s21  }
  0x10   : > { %p3270_p10 = pnand %p3269_p9, %p43_p1  ;;  %s193_s13 = sshll.u32 %s3530_s12, 4  ;;  %s194_s13 = int_to_ptr.vmem [resolvable:$true] %s193_s13 }
  0x11   : > { %s29_s15 = sadd.s32 1, %s3521_s20  ;;  %s26_s16 = ssub.s32 %s3525_s21, %s3622_s14 }
  0x12   : > { %3272 = dma.hbm_to_vmem [thread:$0]  (!%p3270_p10), %s175_s28, 3072, %s177_s6, [#allocation6], %s3528_s10, %s3528_s10, %s3529_s11  }
  0x13   : > { %3275 = dma.hbm_to_vmem [thread:$0]  (!%p3270_p10), %s192_s9, 3072, %s194_s13, [#allocation6], %s3528_s10, %s3528_s10, %s3529_s11  }
  0x14   : > { %p36_p12 = scmp.ne.s32.totalorder %s3521_s20, %s3517_s19  ;;  %p27_p13 = scmp.eq.s32.totalorder %s26_s16, 0 }
  0x15   : > { %p37_p0 = scmp.eq.s32.totalorder %s3525_s21, 0  ;;  %p3286_p5 = scmp.lt.s32.totalorder %s3525_s21, 2 }
  0x16   : > { %p3632_p3 = por %p150_p2, %p36_p12  ;;  %s210_s26 = sand.u32 1, %s3521_s20  }
  0x17   : > { %s3638_s23 = scalar_select %p27_p13, %s3521_s20, %s29_s15  }
  0x18   : > { %p38_p7 = por %p37_p0, %p36_p12  ;;  %s2698_s27 = sshll.u32 %s210_s26, 8 }
  0x19   : > { %s3159_s28 = sshll.u32 %s3525_s21, 8  ;;  %s214_s8 = scalar_lea.vmem [#allocation2], %s2698_s27 }
  0x1a   : > { %s219_s7 = scalar_lea.hbm %s4859_s0, %s3159_s28  ;;  %s222_s9 = sshll.u32 %s214_s8, 4  ;;  %s223_s9 = int_to_ptr.vmem [resolvable:$true] %s222_s9 }
  0x1b   : > { %s220_s10 = sshll.u32 %s219_s7, 4  ;;  %p3645_p2 = pnand %p3286_p5, %p38_p7  ;;  %s221_s10 = int_to_ptr.hbm [resolvable:$true] %s220_s10 }
  0x1c   : > { %s211_s12 = scalar_lea.sflag [#allocation3], %s210_s26  ;;  %s3425_s13 = sshra.s32 %s221_s10, 4  ;;  %s3426_s13 = int_to_ptr.hbm [resolvable:$true] %s3425_s13 }
  0x1d   : > { %s3427_s15 = scalar_lea.hbm %s3426_s13, 256  ;;  %p3429_p10 = pneg %p3645_p2 }
  0x1e   : > { %p3428_p9 = scmp.ne.s32.totalorder %s3426_s13, %s3427_s15  ;;  %s3432_s28 = scalar_lea.hbm %s4859_s0, 512 }
  0x1f   : > { %p3433_p0 = scmp.lt.s32.totalorder %s3426_s13, %s4859_s0  ;;  %p3434_p5 = scmp.lt.s32.totalorder %s3432_s28, %s3427_s15 }
  0x20   : > { %p3430_p12 = pnand %p3429_p10, %p3428_p9 }
  0x21   : > { %p3435_p7 = por %p3434_p5, %p3433_p0 }
  0x22   : > { %p3431_p13 = pneg %p3430_p12 }
  0x24   : > { %p3436_p11 = pnand %p3435_p7, %p3431_p13 }
  0x26   : > { %3439 = shalt.err (!%p3436_p11)
}
  0x27   : > { %s3531_s26 = smov 128   ;;  %s3532_s7 = smov 8  }
  0x28   : > { %3279 = dma.hbm_to_vmem [thread:$0]  (!%p3645_p2), %s221_s10, 4096, %s223_s9, %s211_s12, %s3531_s26, %s3531_s26, %s3532_s7  }
  0x29   : > { %234 = sbr.rel (%p3609_p8) target bundleno = 991 (0x3df), region = 40 }
  0x2e   : > { %s3662_s8 = sand.u32 1, %s3517_s19  }
  0x2f   : > { %s2702_s13 = sshll.u32 %s3662_s8, 8  ;;  %s237_s15 = scalar_lea.sflag [#allocation3], %s3662_s8 }
  0x30   : > { %s3668_s16 = scalar_lea.vmem [#allocation2], %s2702_s13 }
  0x31   : > { %3500 = dma.done.wait (%p3596_p4), %s237_s15, 4096  }
  0x32   : > { %3502 = vsyncadd (%p3596_p4), %s237_s15, 4294963200 }
  0x33   : > { %3504 = dma.done.wait (%p43_p1), [#allocation6], 6144  }
  0x34   : > { %3506 = vsyncadd (%p43_p1), [#allocation6], 4294961152  ;;  %v3175_v0 = vld [vmem:[#allocation5 + $0x78] sm:$0xff]  ;;  %v3174_v2 = vld [vmem:[#allocation5 + $0x70] sm:$0xff]  ;;  %v312_v8 = vlaneseq  ;;  %vm4899_vm2 = vmmov 1   ;;  %v4917_v31 = vmov 0 }
  0x35   : > { %v3167_v1 = vld [vmem:[#allocation5 + $0x38] sm:$0xff]  ;;  %3241 = vmatpush.bf16.msra.mxu2 %v3175_v0  ;;  %v3166_v3 = vld [vmem:[#allocation5 + $0x30] sm:$0xff]  ;;  %1227 = vmatpush.bf16.msra.mxu0 %v3175_v0  ;;  %v3173_v4 = vld [vmem:[#allocation5 + $0x68] sm:$0xff]  ;;  %v4920_v44 = vmov 0  ;;  %v4923_v56 = vmov 0  ;;  %s4681_s11 = scalar_lea.vmem [#allocation8], %s2702_s13 }
  0x36   : > { %3249 = vmatpush.bf16.msra.mxu3 %v3167_v1  ;;  %1364 = vmatpush.bf16.msra.mxu1 %v3167_v1  ;;  %v3165_v5 = vld [vmem:[#allocation5 + $0x28] sm:$0xff]  ;;  %v3172_v6 = vld [vmem:[#allocation5 + $0x60] sm:$0xff]  ;;  %v3171_v9 = vld [vmem:[#allocation5 + $0x58] sm:$0xff]  ;;  %v3678_v11 = vshrl.u32 %v312_v8, 7  ;;  %s3208_s12 = sshll.u32 %s3587_s22, 8  ;;  %s2598_s6 = sshll.u32 %s4681_s11, 4  ;;  %s2599_s6 = int_to_ptr.vmem [resolvable:$true] %s2598_s6 }
  0x37   : > { %v3164_v7 = vld [vmem:[#allocation5 + $0x20] sm:$0xff]  ;;  %v3163_v10 = vld [vmem:[#allocation5 + $0x18] sm:$0xff]  ;;  %v3170_v12 = vld [vmem:[#allocation5 + $0x50] sm:$0xff]  ;;  %s2597_s30 = scalar_lea.hbm %s4864_s5, %s3208_s12  ;;  %s2586_s22 = scalar_lea.sflag [#allocation4], %s3662_s8 }
  0x38   : > { %v3162_v13 = vld [vmem:[#allocation5 + $0x10] sm:$0xff]  ;;  %v3681_v14 = vld [vmem:[%s3668_s16 + $0x80] sm:$0xff]  ;;  %v3684_v15 = vld [vmem:[%s3668_s16 + $0x88] sm:$0xff]  ;;  %v329_v17 = vadd.s32 128, %v3678_v11  ;;  %vm4865_vm0 = vcmp.lt.s32.totalorder %v3678_v11, 1  ;;  %v331_v35 = vadd.s32 144, %v3678_v11 }
  0x39   : > { %3242 = vmatpush.bf16.msra.mxu2 %v3174_v2  ;;  %1228 = vmatpush.bf16.msra.mxu0 %v3174_v2  ;;  %v3687_v16 = vld [vmem:[%s3668_s16 + $0x78] sm:$0xff]  ;;  %v3169_v18 = vld [vmem:[#allocation5 + $0x48] sm:$0xff]  ;;  %v777_v21 = vrot.slane %v3681_v14, 7  ;;  %v778_v22 = vrot.slane %v3684_v15, 7  ;;  %v3168_v24 = vld [vmem:[#allocation5 + $0x40] sm:$0xff]  ;;  %v1155_v29 = vpack.c.bf16 %v3684_v15, %v3681_v14  ;;  %v333_v48 = vadd.s32 160, %v3678_v11 }
  0x3a   : > { %3250 = vmatpush.bf16.msra.mxu3 %v3166_v3  ;;  %1365 = vmatpush.bf16.msra.mxu1 %v3166_v3  ;;  %v3161_v19 = vld [vmem:[#allocation5 + $0x8] sm:$0xff]  ;;  %v4877_v20 = vrot.slane %v3687_v16, 7  ;;  %v461_v23 = vand.u32 15, %v329_v17  ;;  %v3160_v25 = vld [vmem:[#allocation5] sm:$0xff]  ;;  %v3183_v28 = vld [vmem:[#allocation5 + $0xb8] sm:$0xff]  ;;  %v475_v39 = vand.u32 15, %v331_v35 }
  0x3b   : > { %v808_v26 = vsel %vm4865_vm0, %v777_v21, %v778_v22  ;;  %v3182_v32 = vld [vmem:[#allocation5 + $0xb0] sm:$0xff]  ;;  %v3713_v34 = vld [vmem:[%s3668_s16 + $0x98] sm:$0xff]  ;;  %v3181_v36 = vld [vmem:[#allocation5 + $0xa8] sm:$0xff]  ;;  %v489_v51 = vand.u32 15, %v333_v48  ;;  %v335_v60 = vadd.s32 176, %v3678_v11  ;;  %v337_v8 = vadd.s32 192, %v3678_v11 }
  0x3c   : > { %v809_v27 = vsel %vm4865_vm0, %v4877_v20, %v777_v21  ;;  %vm3217_vm1 = vcmp.ne.s32.totalorder %v461_v23, 0  ;;  %v3710_v33 = vld [vmem:[%s3668_s16 + $0x90] sm:$0xff]  ;;  %v780_v38 = vrot.slane %v3713_v34, 7  ;;  %vm3218_vm4 = vcmp.ne.s32.totalorder %v475_v39, 0  ;;  %v3180_v45 = vld [vmem:[#allocation5 + $0xa0] sm:$0xff]  ;;  %v3735_v47 = vld [vmem:[%s3668_s16 + $0xa8] sm:$0xff] }
  0x3d   : > { %3243 = vmatpush.bf16.msra.mxu2 %v3173_v4  ;;  %1229 = vmatpush.bf16.msra.mxu0 %v3173_v4  ;;  %v2804_v30 = vpack.c.bf16 %v808_v26, %v809_v27  ;;  %vm3703_vm3 = vmpackc.low %vm4899_vm2, %vm3217_vm1  ;;  %v779_v37 = vrot.slane %v3710_v33, 7  ;;  %v1156_v42 = vpack.c.bf16 %v3713_v34, %v3710_v33  ;;  %v3732_v46 = vld [vmem:[%s3668_s16 + $0xa0] sm:$0xff]  ;;  %v782_v50 = vrot.slane %v3735_v47, 7  ;;  %v3179_v57 = vld [vmem:[#allocation5 + $0x98] sm:$0xff]  ;;  %s2600_s26 = sshll.u32 %s2597_s30, 4  ;;  %s3475_s29 = scalar_lea.hbm %s4864_s5, 512  ;;  %s2601_s26 = int_to_ptr.hbm [resolvable:$true] %s2600_s26 }
  0x3e   : > { %3251 = vmatpush.bf16.msra.mxu3 %v3165_v5  ;;  %1366 = vmatpush.bf16.msra.mxu1 %v3165_v5  ;;  %v4918_v31 = vsel %vm3703_vm3, 4294967295, %v4917_v31  ;;  %vm3725_vm5 = vmpackc.low %vm4899_vm2, %vm3218_vm4  ;;  %v781_v49 = vrot.slane %v3732_v46, 7  ;;  %vm3219_vm6 = vcmp.ne.s32.totalorder %v489_v51, 0  ;;  %v1157_v54 = vpack.c.bf16 %v3735_v47, %v3732_v46  ;;  %v3754_v58 = vld [vmem:[%s3668_s16 + $0xb0] sm:$0xff]  ;;  %v3757_v59 = vld [vmem:[%s3668_s16 + $0xb8] sm:$0xff]  ;;  %s3469_s7 = sshra.s32 %s2601_s26, 4  ;;  %s3470_s7 = int_to_ptr.hbm [resolvable:$true] %s3469_s7 }
  0x3f   : > { %4919 = vst [vmem:[#allocation12_spill] sm:$0xff] %v4918_v31  ;;  %v806_v40 = vsel %vm4865_vm0, %v779_v37, %v780_v38  ;;  %v807_v41 = vsel %vm4865_vm0, %v778_v22, %v779_v37  ;;  %v4921_v44 = vsel %vm3725_vm5, 4294967295, %v4920_v44  ;;  %vm3747_vm7 = vmpackc.low %vm4899_vm2, %vm3219_vm6  ;;  %v783_v61 = vrot.slane %v3754_v58, 7  ;;  %v3178_v5 = vld [vmem:[#allocation5 + $0x90] sm:$0xff]  ;;  %v3177_v22 = vld [vmem:[#allocation5 + $0x88] sm:$0xff]  ;;  %s3471_s13 = scalar_lea.hbm %s3470_s7, 256  ;;  %p3476_p11 = scmp.lt.s32.totalorder %s3470_s7, %s4864_s5 }
  0x40   : > { %v2808_v43 = vpack.c.bf16 %v806_v40, %v807_v41  ;;  %4922 = vst [vmem:[#allocation13_spill] sm:$0xff] %v4921_v44  ;;  %v804_v52 = vsel %vm4865_vm0, %v781_v49, %v782_v50  ;;  %v805_v53 = vsel %vm4865_vm0, %v780_v38, %v781_v49  ;;  %v4924_v56 = vsel %vm3747_vm7, 4294967295, %v4923_v56  ;;  %v3798_v23 = vld [vmem:[%s3668_s16 + $0xd0] sm:$0xff]  ;;  %v3176_v37 = vld [vmem:[#allocation5 + $0x80] sm:$0xff]  ;;  %v3823_v39 = vld [vmem:[%s3668_s16 + $0xe8] sm:$0xff]  ;;  %p3472_p1 = scmp.ne.s32.totalorder %s3470_s7, %s3471_s13  ;;  %p3477_p2 = scmp.lt.s32.totalorder %s3475_s29, %s3471_s13 }
  0x41   : > { %3244 = vmatpush.bf16.msra.mxu2 %v3172_v6  ;;  %1230 = vmatpush.bf16.msra.mxu0 %v3172_v6  ;;  %v2812_v55 = vpack.c.bf16 %v804_v52, %v805_v53  ;;  %4925 = vst [vmem:[#allocation14_spill] sm:$0xff] %v4924_v56  ;;  %v784_v62 = vrot.slane %v3757_v59, 7  ;;  %v503_v63 = vand.u32 15, %v335_v60  ;;  %v803_v1 = vsel %vm4865_vm0, %v782_v50, %v783_v61  ;;  %v3776_v6 = vld [vmem:[%s3668_s16 + $0xc0] sm:$0xff]  ;;  %v3835_v51 = vld [vmem:[%s3668_s16 + $0xf8] sm:$0xff]  ;;  %v3201_v31 = vld [vmem:[#allocation7 + $0x88] sm:$0xff] }
  0x42   : > { %3252 = vmatpush.bf16.msra.mxu3 %v3164_v7  ;;  %1367 = vmatpush.bf16.msra.mxu1 %v3164_v7  ;;  %v1158_v2 = vpack.c.bf16 %v3757_v59, %v3754_v58  ;;  %v4926_v4 = vmov 0  ;;  %v3779_v7 = vld [vmem:[%s3668_s16 + $0xc8] sm:$0xff]  ;;  %v4929_v21 = vmov 0  ;;  %v787_v26 = vrot.slane %v3798_v23, 7  ;;  %v3820_v38 = vld [vmem:[%s3668_s16 + $0xe0] sm:$0xff]  ;;  %p3473_p4 = pnand %p3472_p1, %p3632_p3  ;;  %p3478_p9 = por %p3477_p2, %p3476_p11 }
  0x43   : > { %v802_v0 = vsel %vm4865_vm0, %v783_v61, %v784_v62  ;;  %vm3220_vm8 = vcmp.ne.s32.totalorder %v503_v63, 0  ;;  %v341_v40 = vadd.s32 224, %v3678_v11  ;;  %v789_v41 = vrot.slane %v3820_v38, 7  ;;  %v3843_v53 = vld [vmem:[%s3668_s16] sm:$0xff] }
  0x44   : > { %v2816_v3 = vpack.c.bf16 %v802_v0, %v803_v1  ;;  %vm3769_vm9 = vmpackc.low %vm4899_vm2, %vm3220_vm8  ;;  %v1161_v49 = vpack.c.bf16 %v3823_v39, %v3820_v38  ;;  %v4935_v52 = vmov 0  ;;  %v349_v61 = vand.u32 15, %v3678_v11  ;;  %v3856_v0 = vld [vmem:[%s3668_s16 + $0xf0] sm:$0xff]  ;;  %p3474_p8 = pneg %p3473_p4 }
  0x45   : > { %3245 = vmatpush.bf16.msra.mxu2 %v3171_v9  ;;  %1231 = vmatpush.bf16.msra.mxu0 %v3171_v9  ;;  %v4927_v4 = vsel %vm3769_vm9, 4294967295, %v4926_v4  ;;  %v785_v9 = vrot.slane %v3776_v6, 7  ;;  %v343_v1 = vadd.s32 240, %v3678_v11 }
  0x46   : > { %3253 = vmatpush.bf16.msra.mxu3 %v3163_v10  ;;  %1368 = vmatpush.bf16.msra.mxu1 %v3163_v10  ;;  %4928 = vst [vmem:[#allocation15_spill] sm:$0xff] %v4927_v4  ;;  %v786_v10 = vrot.slane %v3779_v7, 7  ;;  %vm3209_vm1 = vcmp.ne.s32.totalorder %v349_v61, 0  ;;  %v3194_v4 = vld [vmem:[#allocation7 + $0x50] sm:$0xff]  ;;  %p3479_p10 = pnand %p3478_p9, %p3474_p8 }
  0x47   : > { %v801_v17 = vsel %vm4865_vm0, %v784_v62, %v785_v9  ;;  %vm3861_vm4 = vmpackc.low %vm4899_vm2, %vm3209_vm1 }
  0x49   : > { %3246 = vmatpush.bf16.msra.mxu2 %v3170_v12  ;;  %1232 = vmatpush.bf16.msra.mxu0 %v3170_v12  ;;  %v517_v12 = vand.u32 15, %v337_v8  ;;  %v791_v8 = vrot.slane %v3856_v0, 7 }
  0x4a   : > { %3254 = vmatpush.bf16.msra.mxu3 %v3162_v13  ;;  %1369 = vmatpush.bf16.msra.mxu1 %v3162_v13  ;;  %v800_v13 = vsel %vm4865_vm0, %v785_v9, %v786_v10  ;;  %v559_v9 = vand.u32 15, %v343_v1 }
  0x4b   : > { %vm3221_vm10 = vcmp.ne.s32.totalorder %v517_v12, 0 }
  0x4c   : > { %vm3791_vm11 = vmpackc.low %vm4899_vm2, %vm3221_vm10  ;;  %vm3224_vm6 = vcmp.ne.s32.totalorder %v559_v9, 0 }
  0x4d   : > { %3247 = vmatpush.bf16.msra.mxu2 %v3169_v18  ;;  %1233 = vmatpush.bf16.msra.mxu0 %v3169_v18  ;;  %v1159_v18 = vpack.c.bf16 %v3779_v7, %v3776_v6  ;;  %v4930_v21 = vsel %vm3791_vm11, 4294967295, %v4929_v21  ;;  %vm3875_vm8 = vmpackc.low %vm4899_vm2, %vm3224_vm6 }
  0x4e   : > { %3255 = vmatpush.bf16.msra.mxu3 %v3161_v19  ;;  %1370 = vmatpush.bf16.msra.mxu1 %v3161_v19  ;;  %v2820_v19 = vpack.c.bf16 %v800_v13, %v801_v17  ;;  %4931 = vst [vmem:[#allocation16_spill] sm:$0xff] %v4930_v21  ;;  %v1162_v13 = vpack.c.bf16 %v3835_v51, %v3856_v0  ;;  %v3205_v21 = vld [vmem:[#allocation7 + $0xa8] sm:$0xff] }
  0x51   : > { %3248 = vmatpush.bf16.msra.mxu2 %v3168_v24  ;;  %1234 = vmatpush.bf16.msra.mxu0 %v3168_v24  ;;  %v3801_v24 = vld [vmem:[%s3668_s16 + $0xd8] sm:$0xff] }
  0x52   : > { %3256 = vmatpush.bf16.msra.mxu3 %v3160_v25  ;;  %1371 = vmatpush.bf16.msra.mxu1 %v3160_v25  ;;  %v339_v25 = vadd.s32 208, %v3678_v11  ;;  %v788_v27 = vrot.slane %v3801_v24, 7 }
  0x54   : > { %1275 = vmatmul.bf16.vlgmr.msra.gmra.mxu2 %v1155_v29  ;;  %v798_v29 = vsel %vm4865_vm0, %v787_v26, %v788_v27  ;;  %v797_v48 = vsel %vm4865_vm0, %v788_v27, %v789_v41 }
  0x55   : > { %1533 = vmatpush.bf16.msrb.mxu2 %v3183_v28  ;;  %2805 = vmatmul.msk.bf16.vlgmr.msra.gmra.mxu3 %vm3703_vm3, %v2804_v30  ;;  %v531_v28 = vand.u32 15, %v339_v25  ;;  %v799_v30 = vsel %vm4865_vm0, %v786_v10, %v787_v26  ;;  %v315_v25 = vadd.s32 16, %v3678_v11 }
  0x56   : > { %v2824_v35 = vpack.c.bf16 %v798_v29, %v799_v30 }
  0x57   : > { %vm3222_vm12 = vcmp.ne.s32.totalorder %v531_v28, 0  ;;  %v363_v28 = vand.u32 15, %v315_v25 }
  0x58   : > { %vm3813_vm13 = vmpackc.low %vm4899_vm2, %vm3222_vm12 }
  0x59   : > { %1534 = vmatpush.bf16.msrb.mxu2 %v3182_v32  ;;  %v1160_v32 = vpack.c.bf16 %v3801_v24, %v3798_v23  ;;  %vm3210_vm10 = vcmp.ne.s32.totalorder %v363_v28, 0 }
  0x5a   : > { %vm3890_vm12 = vmpackc.low %vm4899_vm2, %vm3210_vm10 }
  0x5d   : > { %1535 = vmatpush.bf16.msrb.mxu2 %v3181_v36  ;;  %v4932_v36 = vmov 0 }
  0x5e   : > { %v4933_v36 = vsel %vm3813_vm13, 4294967295, %v4932_v36 }
  0x5f   : > { %4934 = vst [vmem:[#allocation17_spill] sm:$0xff] %v4933_v36  ;;  %v3197_v36 = vld [vmem:[#allocation7 + $0x68] sm:$0xff] }
  0x61   : > { %1536 = vmatpush.bf16.msrb.mxu2 %v3180_v45 }
  0x64   : > { %1280 = vmatmul.bf16.gmra.mxu2 %v1156_v42  ;;  %v790_v42 = vrot.slane %v3823_v39, 7 }
  0x65   : > { %2809 = vmatmul.msk.bf16.gmra.mxu3 %vm3725_vm5, %v2808_v43  ;;  %1537 = vmatpush.bf16.msrb.mxu2 %v3179_v57  ;;  %v545_v43 = vand.u32 15, %v341_v40  ;;  %v761_v57 = vrot.slane %v3843_v53, 7  ;;  %v4944_v40 = vmov 0 }
  0x66   : > { %v796_v45 = vsel %vm4865_vm0, %v789_v41, %v790_v42  ;;  %v795_v12 = vsel %vm4865_vm0, %v790_v42, %v791_v8  ;;  %v4945_v40 = vsel %vm3890_vm12, 4294967295, %v4944_v40  ;;  %v4875_v41 = vrot.slane %v3843_v53, 1 }
  0x67   : > { %vm3223_vm14 = vcmp.ne.s32.totalorder %v545_v43, 0  ;;  %v2828_v50 = vpack.c.bf16 %v796_v45, %v797_v48  ;;  %4946 = vst [vmem:[#allocation21_spill] sm:$0xff] %v4945_v40 }
  0x68   : > { %vm3838_vm15 = vmpackc.low %vm4899_vm2, %vm3223_vm14  ;;  %vm4866_vm14 = vcmp.lt.s32.totalorder %v3678_v11, 7 }
  0x69   : > { %1538 = vmatpush.bf16.msrb.mxu2 %v3178_v5  ;;  %v4936_v52 = vsel %vm3838_vm15, 4294967295, %v4935_v52  ;;  %v4938_v5 = vmov 0 }
  0x6a   : > { %4937 = vst [vmem:[#allocation18_spill] sm:$0xff] %v4936_v52  ;;  %v4939_v5 = vsel %vm3861_vm4, 4294967295, %v4938_v5 }
  0x6b   : > { %4940 = vst [vmem:[#allocation19_spill] sm:$0xff] %v4939_v5 }
  0x6d   : > { %1539 = vmatpush.bf16.msrb.mxu2 %v3177_v22  ;;  %v283_v22 = vld [vmem:[%s3668_s16 + $0x18] sm:$0xff] }
  0x6e   : > { %v764_v27 = vrot.slane %v283_v22, 7 }
  0x71   : > { %1540 = vmatpush.bf16.msrb.mxu2 %v3176_v37 }
  0x74   : > { %1285 = vmatmul.bf16.gmra.mxu2 %v1157_v54  ;;  %v281_v54 = vld [vmem:[%s3668_s16 + $0x8] sm:$0xff] }
  0x75   : > { %2813 = vmatmul.msk.bf16.gmra.mxu3 %vm3747_vm7, %v2812_v55  ;;  %v792_v55 = vrot.slane %v3835_v51, 7  ;;  %v762_v60 = vrot.slane %v281_v54, 7  ;;  %v955_v42 = vrot.slane %v281_v54, 1 }
  0x77   : > { %v824_v62 = vsel %vm4865_vm0, %v761_v57, %v762_v60  ;;  %v825_v63 = vsel %vm4865_vm0, %v792_v55, %v761_v57  ;;  %v794_v10 = vsel %vm4865_vm0, %v791_v8, %v792_v55  ;;  %v285_v57 = vld [vmem:[%s3668_s16 + $0x28] sm:$0xff] }
  0x78   : > { %v2832_v17 = vpack.c.bf16 %v794_v10, %v795_v12  ;;  %v4949_v12 = vmov 0 }
  0x84   : > { %1290 = vmatmul.bf16.gmra.mxu2 %v1158_v2  ;;  %v1147_v2 = vpack.c.bf16 %v281_v54, %v3843_v53  ;;  %v284_v54 = vld [vmem:[%s3668_s16 + $0x20] sm:$0xff] }
  0x85   : > { %2817 = vmatmul.msk.bf16.gmra.mxu3 %vm3769_vm9, %v2816_v3  ;;  %v2772_v3 = vpack.c.bf16 %v824_v62, %v825_v63  ;;  %v765_v61 = vrot.slane %v284_v54, 7  ;;  %v766_v62 = vrot.slane %v285_v57, 7  ;;  %v1149_v8 = vpack.c.bf16 %v285_v57, %v284_v54 }
  0x86   : > { %1235 = vmatmul.bf16.vlgmr.msra.gmra.mxu0 %v1147_v2 }
  0x87   : > { %2773 = vmatmul.msk.bf16.vlgmr.msra.gmra.mxu1 %vm3861_vm4, %v2772_v3  ;;  %v820_v1 = vsel %vm4865_vm0, %v765_v61, %v766_v62  ;;  %v821_v2 = vsel %vm4865_vm0, %v764_v27, %v765_v61  ;;  %v316_v3 = vadd.s32 24, %v3678_v11  ;;  %v959_v61 = vrot.slane %v285_v57, 1 }
  0x88   : > { %v2780_v9 = vpack.c.bf16 %v820_v1, %v821_v2  ;;  %v321_v57 = vadd.s32 64, %v3678_v11 }
  0x94   : > { %1295 = vmatmul.bf16.gmra.mxu2 %v1159_v18  ;;  %v4941_v18 = vmov 0 }
  0x95   : > { %2821 = vmatmul.msk.bf16.gmra.mxu3 %vm3791_vm11, %v2820_v19  ;;  %v4942_v18 = vsel %vm3875_vm8, 4294967295, %v4941_v18  ;;  %v282_v19 = vld [vmem:[%s3668_s16 + $0x10] sm:$0xff] }
  0x96   : > { %4943 = vst [vmem:[#allocation20_spill] sm:$0xff] %v4942_v18  ;;  %v763_v26 = vrot.slane %v282_v19, 7  ;;  %v956_v43 = vrot.slane %v282_v19, 1 }
  0x98   : > { %v822_v29 = vsel %vm4865_vm0, %v763_v26, %v764_v27  ;;  %v823_v30 = vsel %vm4865_vm0, %v762_v60, %v763_v26  ;;  %v1016_v48 = vsel %vm4866_vm14, %v955_v42, %v956_v43  ;;  %v317_v60 = vadd.s32 32, %v3678_v11 }
  0x99   : > { %v2776_v37 = vpack.c.bf16 %v822_v29, %v823_v30  ;;  %v286_v30 = vld [vmem:[%s3668_s16 + $0x30] sm:$0xff] }
  0x9a   : > { %v377_v63 = vand.u32 15, %v317_v60  ;;  %v4956_v60 = vmov 0 }
  0x9b   : > { %2777 = vmatmul.msk.bf16.gmra.mxu1 %vm3890_vm12, %v2776_v37  ;;  %vm5019_vm12 = vmmov 1  }
  0x9c   : > { %vm3211_vm10 = vcmp.ne.s32.totalorder %v377_v63, 0 }
  0xa4   : > { %1300 = vmatmul.bf16.gmra.mxu2 %v1160_v32  ;;  %v314_v32 = vadd.s32 8, %v3678_v11 }
  0xa5   : > { %2825 = vmatmul.msk.bf16.gmra.mxu3 %vm3813_vm13, %v2824_v35  ;;  %v1148_v35 = vpack.c.bf16 %v283_v22, %v282_v19  ;;  %v370_v19 = vand.u32 15, %v316_v3 }
  0xa6   : > { %v356_v45 = vand.u32 15, %v314_v32  ;;  %v287_v32 = vld [vmem:[%s3668_s16 + $0x38] sm:$0xff] }
  0xa7   : > { %1240 = vmatmul.bf16.gmra.mxu0 %v1148_v35  ;;  %vm3226_vm0 = vcmp.ne.s32.totalorder %v370_v19, 15  ;;  %v767_v35 = vrot.slane %v286_v30, 7  ;;  %v768_v37 = vrot.slane %v287_v32, 7  ;;  %v289_v19 = vld [vmem:[%s3668_s16 + $0x48] sm:$0xff] }
  0xa8   : > { %vm3225_vm1 = vcmp.ne.s32.totalorder %v356_v45, 15 }
  0xa9   : > { %vm3905_vm6 = vmpackc.low %vm3225_vm1, %vm4899_vm2 }
  0xaa   : > { %vm3922_vm1 = vmpackc.low %vm4899_vm2, %vm3211_vm10 }
  0xab   : > { %v4950_v12 = vsel %vm3922_vm1, 4294967295, %v4949_v12  ;;  %2781 = vmatmul.msk.bf16.gmra.mxu1 %vm3922_vm1, %v2780_v9  ;;  %vm3935_vm10 = vmpackc.low %vm3226_vm0, %vm4899_vm2 }
  0xac   : > { %4951 = vst [vmem:[#allocation22_spill] sm:$0xff] %v4950_v12  ;;  %v976_v12 = vrot.slane %v3754_v58, 1 }
  0xb4   : > { %1305 = vmatmul.bf16.gmra.mxu2 %v1161_v49  ;;  %v1017_v49 = vsel %vm4866_vm14, %v4875_v41, %v955_v42  ;;  %v4983_v41 = vmov 0 }
  0xb5   : > { %2829 = vmatmul.msk.bf16.gmra.mxu3 %vm3838_vm15, %v2828_v50  ;;  %v2868_v50 = vpack.c.bf16 %v1016_v48, %v1017_v49  ;;  %v318_v48 = vadd.s32 40, %v3678_v11  ;;  %v1150_v49 = vpack.c.bf16 %v287_v32, %v286_v30 }
  0xb7   : > { %1245 = vmatmul.bf16.gmra.mxu0 %v1149_v8  ;;  %v384_v63 = vand.u32 15, %v318_v48  ;;  %v961_v48 = vrot.slane %v287_v32, 1  ;;  %v323_v32 = vadd.s32 80, %v3678_v11 }
  0xb9   : > { %vm3227_vm13 = vcmp.ne.s32.totalorder %v384_v63, 15 }
  0xc4   : > { %1310 = vmatmul.bf16.gmra.mxu2 %v1162_v13  ;;  %v957_v13 = vrot.slane %v283_v22, 1  ;;  %v319_v22 = vadd.s32 48, %v3678_v11 }
  0xc5   : > { %2833 = vmatmul.msk.bf16.gmra.mxu3 %vm3875_vm8, %v2832_v17  ;;  %v958_v17 = vrot.slane %v284_v54, 1 }
  0xc6   : > { %v1015_v26 = vsel %vm4866_vm14, %v956_v43, %v957_v13  ;;  %v391_v42 = vand.u32 15, %v319_v22  ;;  %v320_v22 = vadd.s32 56, %v3678_v11 }
  0xc7   : > { %v1014_v25 = vsel %vm4866_vm14, %v957_v13, %v958_v17  ;;  %vm4954_vm14 = vcmp.lt.s32.totalorder %v3678_v11, 1  ;;  %1250 = vmatmul.bf16.gmra.mxu0 %v1150_v49  ;;  %v288_v13 = vld [vmem:[%s3668_s16 + $0x40] sm:$0xff] }
  0xc8   : > { %v2872_v28 = vpack.c.bf16 %v1014_v25, %v1015_v26  ;;  %v818_v43 = vsel %vm4954_vm14, %v767_v35, %v768_v37  ;;  %vm4955_vm8 = vmmov %vm4954_vm14  ;;  %vm3212_vm0 = vcmp.ne.s32.totalorder %v391_v42, 0  ;;  %v769_v25 = vrot.slane %v288_v13, 7 }
  0xc9   : > { %v819_v45 = vsel %vm4955_vm8, %v766_v62, %v767_v35  ;;  %vm3952_vm15 = vmpackc.low %vm4899_vm2, %vm3212_vm0  ;;  %v960_v62 = vrot.slane %v286_v30, 1  ;;  %vm4959_vm8 = vcmp.lt.s32.totalorder %v3678_v11, 7  ;;  %v770_v26 = vrot.slane %v289_v19, 7 }
  0xca   : > { %v4957_v60 = vsel %vm3952_vm15, 4294967295, %v4956_v60  ;;  %vm4960_vm14 = vmmov %vm4959_vm8  ;;  %v1151_v35 = vpack.c.bf16 %v289_v19, %v288_v13  ;;  %v398_v49 = vand.u32 15, %v320_v22 }
  0xcb   : > { %4958 = vst [vmem:[#allocation23_spill] sm:$0xff] %v4957_v60  ;;  %v1012_v1 = vsel %vm4959_vm8, %v959_v61, %v960_v62  ;;  %v1013_v2 = vsel %vm4960_vm14, %v958_v17, %v959_v61  ;;  %vm3965_vm0 = vmpackc.low %vm3227_vm13, %vm4899_vm2  ;;  %vm4963_vm8 = vcmp.lt.s32.totalorder %v3678_v11, 1 }
  0xcc   : > { %v2876_v8 = vpack.c.bf16 %v1012_v1, %v1013_v2  ;;  %v816_v17 = vsel %vm4963_vm8, %v769_v25, %v770_v26  ;;  %vm4964_vm14 = vmmov %vm4963_vm8  ;;  %vm4968_vm8 = vcmp.lt.s32.totalorder %v3678_v11, 7  ;;  %vm3228_vm9 = vcmp.ne.s32.totalorder %v398_v49, 15 }
  0xcd   : > { %v817_v30 = vsel %vm4964_vm14, %v768_v37, %v769_v25  ;;  %v962_v37 = vrot.slane %v288_v13, 1  ;;  %vm4969_vm14 = vmmov %vm4968_vm8  ;;  %v963_v49 = vrot.slane %v289_v19, 1  ;;  %v325_v19 = vadd.s32 96, %v3678_v11 }
  0xce   : > { %v2788_v42 = vpack.c.bf16 %v816_v17, %v817_v30  ;;  %v1011_v61 = vsel %vm4969_vm14, %v960_v62, %v961_v48  ;;  %v322_v30 = vadd.s32 72, %v3678_v11 }
  0xd4   : > { %2869 = vmatmul.msk.bf16.vlgmr.msrb.gmra.mxu2 %vm3905_vm6, %v2868_v50  ;;  %v2784_v50 = vpack.c.bf16 %v818_v43, %v819_v45  ;;  %v4965_v45 = vmov 0 }
  0xd6   : > { %2785 = vmatmul.msk.bf16.gmra.mxu1 %vm3952_vm15, %v2784_v50  ;;  %v1010_v50 = vsel %vm4968_vm8, %v961_v48, %v962_v37  ;;  %vm4972_vm8 = vcmp.lt.s32.totalorder %v3678_v11, 1  ;;  %v4974_v48 = vmov 0 }
  0xd7   : > { %v3919_v10 = vpop.f32.mrf.mxu2  ;;  %1255 = vmatmul.bf16.gmra.mxu0 %v1151_v35  ;;  %v2880_v1 = vpack.c.bf16 %v1010_v50, %v1011_v61  ;;  %vm4973_vm14 = vmmov %vm4972_vm8  ;;  %v412_v50 = vand.u32 15, %v322_v30 }
  0xd9   : > { %vm3229_vm5 = vcmp.ne.s32.totalorder %v412_v50, 15 }
  0xdf   : > { %v3932_v27 = vpop.f32.mrf.mxu2 }
  0xe4   : > { %2873 = vmatmul.msk.bf16.gmra.mxu2 %vm3935_vm10, %v2872_v28  ;;  %v405_v28 = vand.u32 15, %v321_v57  ;;  %v291_v57 = vld [vmem:[%s3668_s16 + $0x58] sm:$0xff] }
  0xe5   : > { %v772_v25 = vrot.slane %v291_v57, 7 }
  0xe6   : > { %vm3213_vm13 = vcmp.ne.s32.totalorder %v405_v28, 0  ;;  %v419_v28 = vand.u32 15, %v323_v32 }
  0xe7   : > { %v3949_v54 = vpop.f32.mrf.mxu2  ;;  %vm3982_vm11 = vmpackc.low %vm4899_vm2, %vm3213_vm13 }
  0xe8   : > { %v4966_v45 = vsel %vm3982_vm11, 4294967295, %v4965_v45  ;;  %2789 = vmatmul.msk.bf16.gmra.mxu1 %vm3982_vm11, %v2788_v42  ;;  %vm3995_vm13 = vmpackc.low %vm3228_vm9, %vm4899_vm2  ;;  %vm3214_vm9 = vcmp.ne.s32.totalorder %v419_v28, 0 }
  0xe9   : > { %4967 = vst [vmem:[#allocation24_spill] sm:$0xff] %v4966_v45  ;;  %vm4012_vm7 = vmpackc.low %vm4899_vm2, %vm3214_vm9 }
  0xea   : > { %v4975_v48 = vsel %vm4012_vm7, 4294967295, %v4974_v48  ;;  %vm4025_vm9 = vmpackc.low %vm3229_vm5, %vm4899_vm2 }
  0xeb   : > { %4976 = vst [vmem:[#allocation25_spill] sm:$0xff] %v4975_v48 }
  0xef   : > { %v3962_v3 = vpop.f32.mrf.mxu2 }
  0xf4   : > { %2877 = vmatmul.msk.bf16.gmra.mxu2 %vm3965_vm0, %v2876_v8  ;;  %v290_v8 = vld [vmem:[%s3668_s16 + $0x50] sm:$0xff] }
  0xf5   : > { %v771_v13 = vrot.slane %v290_v8, 7  ;;  %v1152_v22 = vpack.c.bf16 %v291_v57, %v290_v8 }
  0xf7   : > { %v3979_v43 = vpop.f32.mrf.mxu2  ;;  %v814_v62 = vsel %vm4972_vm8, %v771_v13, %v772_v25  ;;  %v815_v17 = vsel %vm4973_vm14, %v770_v26, %v771_v13  ;;  %1260 = vmatmul.bf16.gmra.mxu0 %v1152_v22  ;;  %v964_v26 = vrot.slane %v290_v8, 1  ;;  %vm4977_vm8 = vcmp.lt.s32.totalorder %v3678_v11, 7 }
  0xf8   : > { %v2792_v35 = vpack.c.bf16 %v814_v62, %v815_v17  ;;  %vm4978_vm14 = vmmov %vm4977_vm8  ;;  %v292_v62 = vld [vmem:[%s3668_s16 + $0x60] sm:$0xff]  ;;  %v293_v17 = vld [vmem:[%s3668_s16 + $0x68] sm:$0xff]  ;;  %v433_v22 = vand.u32 15, %v325_v19 }
  0xf9   : > { %v1008_v61 = vsel %vm4977_vm8, %v963_v49, %v964_v26  ;;  %v773_v8 = vrot.slane %v292_v62, 7  ;;  %v774_v30 = vrot.slane %v293_v17, 7  ;;  %vm4981_vm8 = vcmp.lt.s32.totalorder %v3678_v11, 1 }
  0xfa   : > { %2793 = vmatmul.msk.bf16.gmra.mxu1 %vm4012_vm7, %v2792_v35  ;;  %v1153_v50 = vpack.c.bf16 %v293_v17, %v292_v62  ;;  %vm3215_vm5 = vcmp.ne.s32.totalorder %v433_v22, 0  ;;  %v966_v19 = vrot.slane %v292_v62, 1 }
  0xfb   : > { %vm4042_vm3 = vmpackc.low %vm4899_vm2, %vm3215_vm5 }
  0xfc   : > { %v4984_v41 = vsel %vm4042_vm3, 4294967295, %v4983_v41 }
  0xfd   : > { %4985 = vst [vmem:[#allocation26_spill] sm:$0xff] %v4984_v41 }
  0xff   : > { %v3992_v63 = vpop.f32.mrf.mxu2 }
 0x104   : > { %2881 = vmatmul.msk.bf16.gmra.mxu2 %vm3995_vm13, %v2880_v1  ;;  %v1009_v1 = vsel %vm4978_vm14, %v962_v37, %v963_v49  ;;  %v812_v37 = vsel %vm4981_vm8, %v773_v8, %v774_v30  ;;  %vm4982_vm14 = vmmov %vm4981_vm8  ;;  %v324_v49 = vadd.s32 88, %v3678_v11  ;;  %vm4986_vm8 = vcmp.lt.s32.totalorder %v3678_v11, 7 }
 0x105   : > { %v2884_v13 = vpack.c.bf16 %v1008_v61, %v1009_v1  ;;  %v813_v35 = vsel %vm4982_vm14, %v772_v25, %v773_v8  ;;  %vm4987_vm14 = vmmov %vm4986_vm8 }
 0x106   : > { %v2796_v61 = vpack.c.bf16 %v812_v37, %v813_v35  ;;  %v426_v25 = vand.u32 15, %v324_v49 }
 0x107   : > { %v4009_v42 = vpop.f32.mrf.mxu2  ;;  %1265 = vmatmul.bf16.gmra.mxu0 %v1153_v50  ;;  %v294_v50 = vld [vmem:[%s3668_s16 + $0x70] sm:$0xff] }
 0x108   : > { %vm3230_vm7 = vcmp.ne.s32.totalorder %v426_v25, 15  ;;  %v775_v62 = vrot.slane %v294_v50, 7  ;;  %v326_v25 = vadd.s32 104, %v3678_v11 }
 0x109   : > { %vm4055_vm5 = vmpackc.low %vm3230_vm7, %vm4899_vm2 }
 0x10a   : > { %2797 = vmatmul.msk.bf16.gmra.mxu1 %vm4042_vm3, %v2796_v61  ;;  %v4990_v61 = vrot.slane %v3687_v16, 7  ;;  %v440_v52 = vand.u32 15, %v326_v25  ;;  %v1236_v25 = vpop.f32.mrf.mxu0 }
 0x10f   : > { %v4022_v32 = vpop.f32.mrf.mxu2 }
 0x114   : > { %2885 = vmatmul.msk.bf16.gmra.mxu2 %vm4025_vm9, %v2884_v13  ;;  %v965_v13 = vrot.slane %v291_v57, 1  ;;  %v327_v57 = vadd.s32 112, %v3678_v11 }
 0x116   : > { %v1006_v8 = vsel %vm4986_vm8, %v965_v13, %v966_v19  ;;  %v1007_v22 = vsel %vm4987_vm14, %v964_v26, %v965_v13  ;;  %v447_v49 = vand.u32 15, %v327_v57  ;;  %vm4991_vm8 = vcmp.lt.s32.totalorder %v3678_v11, 1  ;;  %v3199_v57 = vld [vmem:[#allocation7 + $0x78] sm:$0xff] }
 0x117   : > { %v4039_v1 = vpop.f32.mrf.mxu2  ;;  %v2888_v35 = vpack.c.bf16 %v1006_v8, %v1007_v22  ;;  %v810_v26 = vsel %vm4991_vm8, %v775_v62, %v4990_v61  ;;  %vm4992_vm14 = vmmov %vm4991_vm8  ;;  %v1154_v8 = vpack.c.bf16 %v3687_v16, %v294_v50  ;;  %v967_v61 = vrot.slane %v293_v17, 1  ;;  %2026 = vmatpush.bf16.msrb.mxu3 %v3199_v57  ;;  %v3207_v17 = vld [vmem:[#allocation7 + $0xb8] sm:$0xff]  ;;  %v3206_v57 = vld [vmem:[#allocation7 + $0xb0] sm:$0xff] }
 0x118   : > { %v811_v13 = vsel %vm4992_vm14, %v774_v30, %v775_v62  ;;  %vm3216_vm7 = vcmp.ne.s32.totalorder %v447_v49, 0  ;;  %v968_v30 = vrot.slane %v294_v50, 1  ;;  %v3198_v62 = vld [vmem:[#allocation7 + $0x70] sm:$0xff]  ;;  %vm4996_vm8 = vcmp.lt.s32.totalorder %v3678_v11, 7  ;;  %v3196_v50 = vld [vmem:[#allocation7 + $0x60] sm:$0xff]  ;;  %2332 = vmatpush.bf16.msrb.mxu1 %v3207_v17 }
 0x119   : > { %v2800_v22 = vpack.c.bf16 %v810_v26, %v811_v13  ;;  %vm4074_vm3 = vmpackc.low %vm4899_vm2, %vm3216_vm7  ;;  %1270 = vmatmul.bf16.gmra.mxu0 %v1154_v8  ;;  %vm3231_vm7 = vcmp.ne.s32.totalorder %v440_v52, 15  ;;  %v328_v52 = vadd.s32 120, %v3678_v11 }
 0x11a   : > { %v1004_v49 = vsel %vm4996_vm8, %v967_v61, %v968_v30  ;;  %vm4997_vm14 = vmmov %vm4996_vm8 }
 0x11b   : > { %2801 = vmatmul.msk.bf16.gmra.mxu1 %vm4074_vm3, %v2800_v22  ;;  %v1005_v26 = vsel %vm4997_vm14, %v966_v19, %v967_v61  ;;  %2027 = vmatpush.bf16.msrb.mxu3 %v3198_v62  ;;  %vm4087_vm11 = vmpackc.low %vm3231_vm7, %vm4899_vm2  ;;  %v1373_v19 = vpop.f32.mrf.mxu1  ;;  %v3195_v62 = vld [vmem:[#allocation7 + $0x58] sm:$0xff] }
 0x11c   : > { %v2892_v8 = vpack.c.bf16 %v1004_v49, %v1005_v26  ;;  %2333 = vmatpush.bf16.msrb.mxu1 %v3206_v57  ;;  %v970_v49 = vrot.slane %v3681_v14, 1  ;;  %v454_v26 = vand.u32 15, %v328_v52  ;;  %vm5000_vm14 = vmmov %vm4996_vm8  ;;  %v3204_v57 = vld [vmem:[#allocation7 + $0xa0] sm:$0xff]  ;;  %v3193_v14 = vld [vmem:[#allocation7 + $0x48] sm:$0xff] }
 0x11e   : > { %vm3232_vm7 = vcmp.ne.s32.totalorder %v454_v26, 15 }
 0x11f   : > { %v4052_v37 = vpop.f32.mrf.mxu2  ;;  %2028 = vmatpush.bf16.msrb.mxu3 %v3197_v36  ;;  %v969_v36 = vrot.slane %v3687_v16, 1 }
 0x120   : > { %2334 = vmatpush.bf16.msrb.mxu1 %v3205_v21  ;;  %v3203_v21 = vld [vmem:[#allocation7 + $0x98] sm:$0xff] }
 0x121   : > { %v1003_v17 = vsel %vm5000_vm14, %v968_v30, %v969_v36  ;;  %vm5004_vm14 = vmmov %vm4996_vm8 }
 0x123   : > { %2029 = vmatpush.bf16.msrb.mxu3 %v3196_v50  ;;  %v1238_v50 = vpop.f32.mrf.mxu0  ;;  %v1375_v56 = vpop.f32.mrf.mxu1 }
 0x124   : > { %2889 = vmatmul.msk.bf16.gmra.mxu2 %vm4055_vm5, %v2888_v35  ;;  %v4993_v35 = vmov 0  ;;  %2335 = vmatpush.bf16.msrb.mxu1 %v3204_v57  ;;  %v972_v57 = vrot.slane %v3710_v33, 1  ;;  %v1376_v60 = vadd.f32 %v1375_v56, %v1238_v50 }
 0x125   : > { %v4994_v35 = vsel %vm4074_vm3, 4294967295, %v4993_v35  ;;  %vm4105_vm3 = vmpackc.low %vm3232_vm7, %vm4899_vm2 }
 0x126   : > { %4995 = vst [vmem:[#allocation27_spill] sm:$0xff] %v4994_v35 }
 0x127   : > { %v4071_v18 = vpop.f32.mrf.mxu2  ;;  %2030 = vmatpush.bf16.msrb.mxu3 %v3195_v62  ;;  %v3192_v62 = vld [vmem:[#allocation7 + $0x40] sm:$0xff] }
 0x128   : > { %2336 = vmatpush.bf16.msrb.mxu1 %v3203_v21 }
 0x12b   : > { %2031 = vmatpush.bf16.msrb.mxu3 %v3194_v4  ;;  %v330_v4 = vadd.s32 136, %v3678_v11  ;;  %v1241_v30 = vpop.f32.mrf.mxu0 }
 0x12f   : > { %v4084_v13 = vpop.f32.mrf.mxu2  ;;  %2032 = vmatpush.bf16.msrb.mxu3 %v3193_v14  ;;  %v468_v14 = vand.u32 15, %v330_v4  ;;  %v332_v4 = vadd.s32 152, %v3678_v11 }
 0x131   : > { %vm3233_vm7 = vcmp.ne.s32.totalorder %v468_v14, 15 }
 0x132   : > { %vm4123_vm15 = vmpackc.low %vm3233_vm7, %vm4899_vm2 }
 0x133   : > { %2033 = vmatpush.bf16.msrb.mxu3 %v3192_v62  ;;  %v3200_v62 = vld [vmem:[#allocation7 + $0x80] sm:$0xff]  ;;  %v1243_v48 = vpop.f32.mrf.mxu0 }
 0x134   : > { %2893 = vmatmul.msk.bf16.gmra.mxu2 %vm4087_vm11, %v2892_v8  ;;  %v1002_v8 = vsel %vm4996_vm8, %v969_v36, %v970_v49  ;;  %v3202_v36 = vld [vmem:[#allocation7 + $0x90] sm:$0xff] }
 0x135   : > { %v2896_v16 = vpack.c.bf16 %v1002_v8, %v1003_v17  ;;  %v1378_v8 = vpop.f32.mrf.mxu1  ;;  %2337 = vmatpush.bf16.msrb.mxu1 %v3202_v36  ;;  %v971_v17 = vrot.slane %v3684_v15, 1  ;;  %v973_v36 = vrot.slane %v3713_v34, 1 }
 0x137   : > { %v4094_v61 = vpop.f32.mrf.mxu2  ;;  %v1001_v21 = vsel %vm5004_vm14, %v970_v49, %v971_v17  ;;  %vm5008_vm14 = vmmov %vm4996_vm8 }
 0x139   : > { %2338 = vmatpush.bf16.msrb.mxu1 %v3201_v31  ;;  %v1374_v31 = vadd.f32 %v1373_v19, %v1236_v25  ;;  %v999_v25 = vsel %vm5008_vm14, %v972_v57, %v973_v36 }
 0x13d   : > { %2339 = vmatpush.bf16.msrb.mxu1 %v3200_v62  ;;  %v1380_v33 = vpop.f32.mrf.mxu1  ;;  %v1246_v62 = vpop.f32.mrf.mxu0 }
 0x13f   : > { %v4102_v44 = vpop.f32.mrf.mxu2 }
 0x144   : > { %2897 = vmatmul.msk.bf16.gmra.mxu2 %vm4105_vm3, %v2896_v16  ;;  %v1000_v16 = vsel %vm4996_vm8, %v971_v17, %v972_v57  ;;  %v974_v17 = vrot.slane %v3732_v46, 1  ;;  %v1379_v57 = vadd.f32 %v1378_v8, %v1241_v30 }
 0x145   : > { %v2900_v41 = vpack.c.bf16 %v1000_v16, %v1001_v21  ;;  %v4135_v16 = vld [vmem:[%s4861_s2] ss:$0 sm:$0xff]  ;;  %v482_v21 = vand.u32 15, %v332_v4  ;;  %v1383_v45 = vpop.f32.mrf.mxu1 }
 0x147   : > { %v4112_v26 = vpop.f32.mrf.mxu2  ;;  %vm3234_vm7 = vcmp.ne.s32.totalorder %v482_v21, 15 }
 0x148   : > { %5003 = vst [vmem:[#allocation28_spill] sm:$0xff] %v4112_v26  ;;  %vm4143_vm1 = vmpackc.low %vm3234_vm7, %vm4899_vm2 }
 0x149   : > { %vm5014_vm7 = vmmov %vm5008_vm14 }
 0x14f   : > { %v4120_v35 = vpop.f32.mrf.mxu2 }
 0x150   : > { %5005 = vst [vmem:[#allocation29_spill] sm:$0xff] %v4120_v35 }
 0x154   : > { %2901 = vmatmul.msk.bf16.gmra.mxu2 %vm4123_vm15, %v2900_v41  ;;  %v998_v41 = vsel %vm4996_vm8, %v973_v36, %v974_v17  ;;  %v1248_v36 = vpop.f32.mrf.mxu0  ;;  %vm5012_vm8 = vcmp.lt.s32.totalorder %v3678_v11, 1 }
 0x157   : > { %v1542_v49 = vpop.f32.mrf.mxu2 }
 0x158   : > { %v1622_v14 = vadd.f32 %v1542_v49, %v1374_v31  ;;  %v2904_v31 = vpack.c.bf16 %v998_v41, %v999_v25  ;;  %v334_v25 = vadd.s32 168, %v3678_v11 }
 0x15a   : > { %v1658_v34 = vadd.f32 %v4135_v16, %v1622_v14  ;;  %v1385_v14 = vpop.f32.mrf.mxu1 }
 0x15c   : > { %v4147_v4 = vmax.f32 %v1658_v34, 0.0  ;;  %v975_v34 = vrot.slane %v3735_v47, 1 }
 0x15e   : > { %5011 = vst [vmem:[#allocation30_spill] sm:$0xff] %v4147_v4  ;;  %v4901_v21 = vrot.slane %v4147_v4, 7  ;;  %v996_v35 = vsel %vm5008_vm14, %v975_v34, %v976_v12  ;;  %v997_v47 = vsel %vm5014_vm7, %v974_v17, %v975_v34  ;;  %v4904_v58 = vrot.slane %v4147_v4, 1  ;;  %vm5016_vm14 = vmmov %vm5014_vm7 }
 0x15f   : > { %v1544_v46 = vpop.f32.mrf.mxu2 }
 0x160   : > { %v1623_v19 = vadd.f32 %v1544_v46, %v1376_v60 }
 0x162   : > { %v1659_v56 = vadd.f32 %v4135_v16, %v1623_v19  ;;  %v1388_v26 = vpop.f32.mrf.mxu1 }
 0x164   : > { %v1691_v50 = vmax.f32 %v1659_v56, 0.0  ;;  %2905 = vmatmul.msk.bf16.gmra.mxu2 %vm4143_vm1, %v2904_v31  ;;  %v496_v31 = vand.u32 15, %v334_v25  ;;  %v1381_v56 = vadd.f32 %v1380_v33, %v1243_v48  ;;  %v5020_v25 = vmov 0 }
 0x166   : > { %v1723_v60 = vrot.slane %v1691_v50, 7  ;;  %v1946_v41 = vpack.c.bf16 %v1691_v50, %v4147_v4  ;;  %v1819_v40 = vrot.slane %v1691_v50, 1  ;;  %vm3235_vm2 = vcmp.ne.s32.totalorder %v496_v31, 15 }
 0x167   : > { %v1547_v46 = vpop.f32.mrf.mxu2  ;;  %vm4180_vm4 = vmpackc.low %vm3235_vm2, %vm5019_vm12  ;;  %v336_v31 = vadd.s32 184, %v3678_v11 }
 0x168   : > { %v1624_v19 = vadd.f32 %v1547_v46, %v1379_v57  ;;  %2034 = vmatmul.bf16.vlgmr.msrb.gmra.mxu3 %v1946_v41  ;;  %v4161_v30 = vsel %vm5012_vm8, %v4901_v21, %v1723_v60  ;;  %v1251_v46 = vpop.f32.mrf.mxu0  ;;  %vm5015_vm8 = vmmov %vm5014_vm7  ;;  %v1880_v33 = vsel %vm5016_vm14, %v4904_v58, %v1819_v40  ;;  %vm5017_vm7 = vcmp.lt.s32.totalorder %v3678_v11, 1 }
 0x169   : > { %5013 = vst [vmem:[#allocation31_spill] sm:$0xff] %v4161_v30  ;;  %v2908_v30 = vpack.c.bf16 %v996_v35, %v997_v47  ;;  %v5021_v25 = vsel %vm4180_vm4, 4294967295, %v5020_v25  ;;  %v977_v47 = vrot.slane %v3757_v59, 1  ;;  %vm5022_vm2 = vmmov %vm5017_vm7 }
 0x16a   : > { %v1660_v8 = vadd.f32 %v4135_v16, %v1624_v19 }
 0x16c   : > { %v1692_v5 = vmax.f32 %v1660_v8, 0.0 }
 0x16e   : > { %v1724_v57 = vrot.slane %v1692_v5, 7  ;;  %v1820_v41 = vrot.slane %v1692_v5, 1 }
 0x16f   : > { %v1549_v21 = vpop.f32.mrf.mxu2 }
 0x170   : > { %v1625_v19 = vadd.f32 %v1549_v21, %v1381_v56  ;;  %v1879_v48 = vsel %vm5015_vm8, %v1819_v40, %v1820_v41  ;;  %v4177_v17 = vsel %vm5017_vm7, %v1723_v60, %v1724_v57  ;;  %v4187_v21 = vpop.f32.mrf.mxu3  ;;  %v1384_v40 = vadd.f32 %v1383_v45, %v1246_v62  ;;  %v1253_v55 = vpop.f32.mrf.mxu0 }
 0x171   : > { %5018 = vst [vmem:[#allocation32_spill] sm:$0xff] %v4177_v17  ;;  %v3092_v50 = vpack.c.bf16 %v1879_v48, %v1880_v33  ;;  %v978_v48 = vrot.slane %v3776_v6, 1  ;;  %v510_v62 = vand.u32 15, %v336_v31 }
 0x172   : > { %v1661_v35 = vadd.f32 %v4135_v16, %v1625_v19 }
 0x173   : > { %3093 = vmatmul.msk.bf16.vlgmr.msrb.gmra.mxu1 %vm3905_vm6, %v3092_v50  ;;  %v1390_v50 = vpop.f32.mrf.mxu1  ;;  %vm5023_vm6 = vmmov %vm5015_vm8  ;;  %vm3236_vm14 = vcmp.ne.s32.totalorder %v510_v62, 15 }
 0x174   : > { %v1693_v34 = vmax.f32 %v1661_v35, 0.0  ;;  %2909 = vmatmul.msk.bf16.gmra.mxu2 %vm4180_vm4, %v2908_v30  ;;  %v1386_v30 = vadd.f32 %v1385_v14, %v1248_v36  ;;  %v994_v59 = vsel %vm5023_vm6, %v977_v47, %v978_v48  ;;  %vm5024_vm8 = vmmov %vm5023_vm6  ;;  %vm5027_vm4 = vcmp.lt.s32.totalorder %v3678_v11, 1 }
 0x175   : > { %v995_v6 = vsel %vm5024_vm8, %v976_v12, %v977_v47  ;;  %vm5025_vm7 = vmmov %vm5023_vm6 }
 0x176   : > { %v1725_v60 = vrot.slane %v1693_v34, 7  ;;  %v1947_v8 = vpack.c.bf16 %v1693_v34, %v1692_v5  ;;  %v1821_v35 = vrot.slane %v1693_v34, 1  ;;  %v2912_v4 = vpack.c.bf16 %v994_v59, %v995_v6 }
 0x177   : > { %v1552_v56 = vpop.f32.mrf.mxu2  ;;  %v979_v6 = vrot.slane %v3779_v7, 1 }
 0x178   : > { %v1626_v19 = vadd.f32 %v1552_v56, %v1384_v40  ;;  %2039 = vmatmul.bf16.gmra.mxu3 %v1947_v8  ;;  %v4196_v33 = vsel %vm5022_vm2, %v1724_v57, %v1725_v60  ;;  %v4205_v40 = vpop.f32.mrf.mxu3  ;;  %vm5026_vm2 = vmmov %vm5023_vm6 }
 0x179   : > { %v1878_v36 = vsel %vm5026_vm2, %v1820_v41, %v1821_v35  ;;  %vm4216_vm6 = vmpackc.low %vm3236_vm14, %vm5019_vm12  ;;  %v1389_v41 = vadd.f32 %v1388_v26, %v1251_v46  ;;  %v1391_v46 = vadd.f32 %v1390_v50, %v1253_v55 }
 0x17a   : > { %v1662_v5 = vadd.f32 %v4135_v16, %v1626_v19  ;;  %v1256_v19 = vpop.f32.mrf.mxu0  ;;  %vm5031_vm8 = vmmov %vm5026_vm2 }
 0x17c   : > { %v1694_v58 = vmax.f32 %v1662_v5, 0.0  ;;  %v1393_v5 = vpop.f32.mrf.mxu1 }
 0x17e   : > { %v1726_v57 = vrot.slane %v1694_v58, 7  ;;  %v1822_v8 = vrot.slane %v1694_v58, 1 }
 0x17f   : > { %v1554_v56 = vpop.f32.mrf.mxu2 }
 0x180   : > { %v1627_v45 = vadd.f32 %v1554_v56, %v1386_v30  ;;  %v1877_v31 = vsel %vm5025_vm7, %v1821_v35, %v1822_v8  ;;  %v4213_v14 = vsel %vm5027_vm4, %v1725_v60, %v1726_v57  ;;  %v338_v35 = vadd.s32 200, %v3678_v11  ;;  %vm5032_vm7 = vmmov %vm5026_vm2 }
 0x181   : > { %v3096_v34 = vpack.c.bf16 %v1877_v31, %v1878_v36  ;;  %v980_v56 = vrot.slane %v3798_v23, 1  ;;  %v993_v23 = vsel %vm5031_vm8, %v978_v48, %v979_v6  ;;  %vm5037_vm8 = vmmov %vm5026_vm2 }
 0x182   : > { %v1663_v47 = vadd.f32 %v4135_v16, %v1627_v45  ;;  %v4228_v45 = vpop.f32.mrf.mxu3 }
 0x183   : > { %3097 = vmatmul.msk.bf16.gmra.mxu1 %vm3935_vm10, %v3096_v34  ;;  %vm5030_vm10 = vmmov %vm5026_vm2 }
 0x184   : > { %v1695_v62 = vmax.f32 %v1663_v47, 0.0  ;;  %2913 = vmatmul.msk.bf16.gmra.mxu2 %vm4216_vm6, %v2912_v4  ;;  %v992_v7 = vsel %vm5030_vm10, %v979_v6, %v980_v56  ;;  %v1258_v47 = vpop.f32.mrf.mxu0 }
 0x185   : > { %v2916_v17 = vpack.c.bf16 %v992_v7, %v993_v23 }
 0x186   : > { %v1727_v60 = vrot.slane %v1695_v62, 7  ;;  %v1948_v30 = vpack.c.bf16 %v1695_v62, %v1694_v58  ;;  %v524_v58 = vand.u32 15, %v338_v35  ;;  %v1823_v36 = vrot.slane %v1695_v62, 1 }
 0x187   : > { %v1557_v59 = vpop.f32.mrf.mxu2 }
 0x188   : > { %v1628_v31 = vadd.f32 %v1557_v59, %v1389_v41  ;;  %2044 = vmatmul.bf16.gmra.mxu3 %v1948_v30  ;;  %v4232_v29 = vsel %vm5027_vm4, %v1726_v57, %v1727_v60  ;;  %v1395_v41 = vpop.f32.mrf.mxu1  ;;  %vm3237_vm14 = vcmp.ne.s32.totalorder %v524_v58, 15  ;;  %v1876_v55 = vsel %vm5026_vm2, %v1822_v8, %v1823_v36 }
 0x189   : > { %vm4250_vm10 = vmpackc.low %vm3237_vm14, %vm5019_vm12  ;;  %v1394_v8 = vadd.f32 %v1393_v5, %v1256_v19 }
 0x18a   : > { %v1664_v4 = vadd.f32 %v4135_v16, %v1628_v31  ;;  %v4254_v6 = vpop.f32.mrf.mxu3  ;;  %vm5038_vm14 = vmmov %vm5026_vm2 }
 0x18c   : > { %v1696_v34 = vmax.f32 %v1664_v4, 0.0 }
 0x18e   : > { %v1728_v30 = vrot.slane %v1696_v34, 7  ;;  %v1824_v57 = vrot.slane %v1696_v34, 1 }
 0x18f   : > { %v1559_v59 = vpop.f32.mrf.mxu2 }
 0x190   : > { %v1629_v26 = vadd.f32 %v1559_v59, %v1391_v46  ;;  %v1875_v35 = vsel %vm5032_vm7, %v1823_v36, %v1824_v57  ;;  %v4247_v50 = vsel %vm5027_vm4, %v1727_v60, %v1728_v30  ;;  %v340_v46 = vadd.s32 216, %v3678_v11  ;;  %v1261_v36 = vpop.f32.mrf.mxu0  ;;  %v1398_v23 = vpop.f32.mrf.mxu1 }
 0x191   : > { %5033 = vst [vmem:[#allocation33_spill] sm:$0xff] %v4247_v50  ;;  %v3100_v62 = vpack.c.bf16 %v1875_v35, %v1876_v55  ;;  %v981_v59 = vrot.slane %v3801_v24, 1  ;;  %v982_v35 = vrot.slane %v3820_v38, 1 }
 0x192   : > { %v1665_v31 = vadd.f32 %v4135_v16, %v1629_v26  ;;  %v538_v5 = vand.u32 15, %v340_v46  ;;  %v4271_v55 = vpop.f32.mrf.mxu3 }
 0x193   : > { %3101 = vmatmul.msk.bf16.gmra.mxu1 %vm3965_vm0, %v3100_v62  ;;  %vm5036_vm0 = vmmov %vm5027_vm4  ;;  %v990_v24 = vsel %vm5037_vm8, %v981_v59, %v982_v35  ;;  %v991_v38 = vsel %vm5038_vm14, %v980_v56, %v981_v59 }
 0x194   : > { %v1697_v4 = vmax.f32 %v1665_v31, 0.0  ;;  %2917 = vmatmul.msk.bf16.gmra.mxu2 %vm4250_vm10, %v2916_v17  ;;  %vm3238_vm7 = vcmp.ne.s32.totalorder %v538_v5, 15  ;;  %vm5039_vm4 = vmmov %vm5026_vm2 }
 0x195   : > { %vm4286_vm8 = vmpackc.low %vm3238_vm7, %vm5019_vm12 }
 0x196   : > { %v1729_v60 = vrot.slane %v1697_v4, 7  ;;  %v1949_v58 = vpack.c.bf16 %v1697_v4, %v1696_v34  ;;  %v1396_v34 = vadd.f32 %v1395_v41, %v1258_v47  ;;  %v1825_v62 = vrot.slane %v1697_v4, 1  ;;  %vm5043_vm14 = vmmov %vm5026_vm2 }
 0x197   : > { %v1562_v7 = vpop.f32.mrf.mxu2  ;;  %vm5044_vm7 = vmmov %vm5026_vm2 }
 0x198   : > { %v1630_v26 = vadd.f32 %v1562_v7, %v1394_v8  ;;  %2049 = vmatmul.bf16.gmra.mxu3 %v1949_v58  ;;  %v4266_v9 = vsel %vm5036_vm0, %v1728_v30, %v1729_v60  ;;  %v2920_v7 = vpack.c.bf16 %v990_v24, %v991_v38  ;;  %v1874_v47 = vsel %vm5039_vm4, %v1824_v57, %v1825_v62  ;;  %v1263_v41 = vpop.f32.mrf.mxu0  ;;  %v1400_v59 = vpop.f32.mrf.mxu1 }
 0x199   : > { %v1399_v57 = vadd.f32 %v1398_v23, %v1261_v36  ;;  %v342_v24 = vadd.s32 232, %v3678_v11 }
 0x19a   : > { %v1666_v19 = vadd.f32 %v4135_v16, %v1630_v26 }
 0x19c   : > { %v1698_v31 = vmax.f32 %v1666_v19, 0.0 }
 0x19e   : > { %v1730_v8 = vrot.slane %v1698_v31, 7  ;;  %v1826_v30 = vrot.slane %v1698_v31, 1 }
 0x19f   : > { %v1564_v58 = vpop.f32.mrf.mxu2 }
 0x1a0   : > { %v1631_v17 = vadd.f32 %v1564_v58, %v1396_v34  ;;  %v1873_v46 = vsel %vm5026_vm2, %v1825_v62, %v1826_v30  ;;  %v4283_v4 = vsel %vm5036_vm0, %v1729_v60, %v1730_v8  ;;  %v4295_v34 = vpop.f32.mrf.mxu3  ;;  %v983_v58 = vrot.slane %v3823_v39, 1 }
 0x1a1   : > { %v3104_v26 = vpack.c.bf16 %v1873_v46, %v1874_v47  ;;  %v984_v46 = vrot.slane %v3856_v0, 1  ;;  %v1401_v47 = vadd.f32 %v1400_v59, %v1263_v41 }
 0x1a2   : > { %v1667_v19 = vadd.f32 %v4135_v16, %v1631_v17  ;;  %v989_v0 = vsel %vm5044_vm7, %v982_v35, %v983_v58 }
 0x1a3   : > { %3105 = vmatmul.msk.bf16.gmra.mxu1 %vm3995_vm13, %v3104_v26  ;;  %vm5042_vm13 = vmmov %vm5036_vm0  ;;  %v1403_v26 = vpop.f32.mrf.mxu1  ;;  %v988_v39 = vsel %vm5043_vm14, %v983_v58, %v984_v46 }
 0x1a4   : > { %v1699_v5 = vmax.f32 %v1667_v19, 0.0  ;;  %2921 = vmatmul.msk.bf16.gmra.mxu2 %vm4286_vm8, %v2920_v7  ;;  %v552_v7 = vand.u32 15, %v342_v24  ;;  %vm5045_vm0 = vmmov %vm5039_vm4 }
 0x1a5   : > { %vm5049_vm7 = vmmov %vm5042_vm13 }
 0x1a6   : > { %v1731_v60 = vrot.slane %v1699_v5, 7  ;;  %v1950_v62 = vpack.c.bf16 %v1699_v5, %v1698_v31  ;;  %v1266_v31 = vpop.f32.mrf.mxu0  ;;  %v1827_v19 = vrot.slane %v1699_v5, 1  ;;  %vm3239_vm2 = vcmp.ne.s32.totalorder %v552_v7, 15 }
 0x1a7   : > { %v1567_v38 = vpop.f32.mrf.mxu2  ;;  %vm4322_vm14 = vmpackc.low %vm3239_vm2, %vm5019_vm12 }
 0x1a8   : > { %v1632_v17 = vadd.f32 %v1567_v38, %v1399_v57  ;;  %2054 = vmatmul.bf16.gmra.mxu3 %v1950_v62  ;;  %v4302_v2 = vsel %vm5042_vm13, %v1730_v8, %v1731_v60  ;;  %v2924_v38 = vpack.c.bf16 %v988_v39, %v989_v0  ;;  %v4311_v36 = vpop.f32.mrf.mxu3  ;;  %v1872_v59 = vsel %vm5045_vm0, %v1826_v30, %v1827_v19  ;;  %vm5053_vm2 = vmmov %vm5045_vm0 }
 0x1a9   : > { %v1404_v30 = vadd.f32 %v1403_v26, %v1266_v31  ;;  %v344_v39 = vadd.s32 248, %v3678_v11  ;;  %v5104_v11 = vld [vmem:[#allocation32_spill] sm:$0xff] }
 0x1aa   : > { %v1668_v23 = vadd.f32 %v4135_v16, %v1632_v17 }
 0x1ab   : > { %v566_v26 = vand.u32 15, %v344_v39 }
 0x1ac   : > { %v1700_v50 = vmax.f32 %v1668_v23, 0.0 }
 0x1ae   : > { %v1732_v57 = vrot.slane %v1700_v50, 7  ;;  %v1828_v8 = vrot.slane %v1700_v50, 1  ;;  %v1268_v7 = vpop.f32.mrf.mxu0 }
 0x1af   : > { %v1569_v62 = vpop.f32.mrf.mxu2 }
 0x1b0   : > { %v1633_v17 = vadd.f32 %v1569_v62, %v1401_v47  ;;  %v1871_v41 = vsel %vm5039_vm4, %v1827_v19, %v1828_v8  ;;  %v4319_v5 = vsel %vm5042_vm13, %v1731_v60, %v1732_v57  ;;  %v1405_v47 = vpop.f32.mrf.mxu1  ;;  %v985_v62 = vrot.slane %v3835_v51, 1  ;;  %vm5054_vm13 = vmmov %vm5045_vm0 }
 0x1b1   : > { %5046 = vst [vmem:[#allocation34_spill] sm:$0xff] %v4319_v5  ;;  %v3108_v24 = vpack.c.bf16 %v1871_v41, %v1872_v59  ;;  %vm3240_vm4 = vcmp.ne.s32.totalorder %v566_v26, 15 }
 0x1b2   : > { %v1669_v58 = vadd.f32 %v4135_v16, %v1633_v17  ;;  %v3191_v17 = vld [vmem:[#allocation7 + $0x38] sm:$0xff] }
 0x1b3   : > { %3109 = vmatmul.msk.bf16.gmra.mxu1 %vm4025_vm9, %v3108_v24  ;;  %vm5051_vm9 = vmmov %vm5045_vm0  ;;  %2163 = vmatpush.bf16.msrb.mxu0 %v3191_v17 }
 0x1b4   : > { %v1701_v23 = vmax.f32 %v1669_v58, 0.0  ;;  %2925 = vmatmul.msk.bf16.gmra.mxu2 %vm4322_vm14, %v2924_v38  ;;  %v4339_v38 = vpop.f32.mrf.mxu3  ;;  %v987_v51 = vsel %vm5051_vm9, %v984_v46, %v985_v62  ;;  %v5052_v58 = vrot.slane %v3843_v53, 1  ;;  %vm4357_vm9 = vmpackc.low %vm3240_vm4, %vm5019_vm12 }
 0x1b5   : > { %vm5057_vm12 = vmmov %vm5049_vm7 }
 0x1b6   : > { %v1733_v60 = vrot.slane %v1701_v23, 7  ;;  %v1951_v19 = vpack.c.bf16 %v1701_v23, %v1700_v50  ;;  %v1406_v50 = vadd.f32 %v1405_v47, %v1268_v7  ;;  %v1829_v59 = vrot.slane %v1701_v23, 1  ;;  %vm5060_vm4 = vmmov %vm5049_vm7 }
 0x1b7   : > { %v1572_v0 = vpop.f32.mrf.mxu2  ;;  %v5115_v47 = vpack.c.bf16 %v4302_v2, %v4283_v4 }
 0x1b8   : > { %v1634_v41 = vadd.f32 %v1572_v0, %v1404_v30  ;;  %2059 = vmatmul.bf16.gmra.mxu3 %v1951_v19  ;;  %v4335_v28 = vsel %vm5049_vm7, %v1732_v57, %v1733_v60  ;;  %v1018_v57 = vsel %vm5053_vm2, %v985_v62, %v5052_v58  ;;  %v1271_v0 = vpop.f32.mrf.mxu0  ;;  %v1870_v46 = vsel %vm5054_vm13, %v1828_v8, %v1829_v59  ;;  %vm5059_vm2 = vmmov %vm5045_vm0 }
 0x1b9   : > { %5050 = vst [vmem:[#allocation35_spill] sm:$0xff] %v4335_v28  ;;  %v2928_v28 = vpack.c.bf16 %v1018_v57, %v987_v51  ;;  %vm5063_vm13 = vmmov %vm5059_vm2 }
 0x1ba   : > { %v1670_v31 = vadd.f32 %v4135_v16, %v1634_v41  ;;  %v1408_v41 = vpop.f32.mrf.mxu1 }
 0x1bb   : > { %v1409_v8 = vadd.f32 %v1408_v41, %v1271_v0 }
 0x1bc   : > { %v1702_v24 = vmax.f32 %v1670_v31, 0.0 }
 0x1be   : > { %v1734_v30 = vrot.slane %v1702_v24, 7  ;;  %v1830_v19 = vrot.slane %v1702_v24, 1 }
 0x1bf   : > { %v1574_v5 = vpop.f32.mrf.mxu2 }
 0x1c0   : > { %v1635_v39 = vadd.f32 %v1574_v5, %v1406_v50  ;;  %v1869_v23 = vsel %vm5045_vm0, %v1829_v59, %v1830_v19  ;;  %v4354_v53 = vsel %vm5049_vm7, %v1733_v60, %v1734_v30  ;;  %v4364_v5 = vpop.f32.mrf.mxu3  ;;  %v1273_v51 = vpop.f32.mrf.mxu0 }
 0x1c1   : > { %v3112_v7 = vpack.c.bf16 %v1869_v23, %v1870_v46  ;;  %v3190_v46 = vld [vmem:[#allocation7 + $0x30] sm:$0xff] }
 0x1c2   : > { %v1671_v62 = vadd.f32 %v4135_v16, %v1635_v39  ;;  %v1410_v58 = vpop.f32.mrf.mxu1  ;;  %2164 = vmatpush.bf16.msrb.mxu0 %v3190_v46 }
 0x1c3   : > { %3113 = vmatmul.msk.bf16.gmra.mxu1 %vm4055_vm5, %v3112_v7  ;;  %vm5058_vm5 = vmmov %vm5045_vm0 }
 0x1c4   : > { %v1703_v31 = vmax.f32 %v1671_v62, 0.0  ;;  %2929 = vmatmul.msk.bf16.gmra.mxu2 %vm4357_vm9, %v2928_v28  ;;  %v1411_v28 = vadd.f32 %v1410_v58, %v1273_v51  ;;  %v1414_v51 = vadd.f32 %v4187_v21, %v3919_v10  ;;  %vm5061_vm0 = vmmov %vm5060_vm4  ;;  %v1416_v10 = vadd.f32 %v4205_v40, %v3932_v27 }
 0x1c5   : > { %vm5064_vm7 = vmmov %vm5061_vm0 }
 0x1c6   : > { %v1735_v60 = vrot.slane %v1703_v31, 7  ;;  %v1952_v17 = vpack.c.bf16 %v1703_v31, %v1702_v24  ;;  %v1831_v39 = vrot.slane %v1703_v31, 1 }
 0x1c7   : > { %v1577_v26 = vpop.f32.mrf.mxu2 }
 0x1c8   : > { %v1636_v50 = vadd.f32 %v1577_v26, %v1409_v8  ;;  %2064 = vmatmul.bf16.gmra.mxu3 %v1952_v17  ;;  %v4370_v59 = vsel %vm5057_vm12, %v1734_v30, %v1735_v60  ;;  %v4375_v0 = vpop.f32.mrf.mxu3  ;;  %v1868_v8 = vsel %vm5059_vm2, %v1830_v19, %v1831_v39  ;;  %vm5065_vm12 = vmmov %vm5059_vm2 }
 0x1c9   : > { %v3020_v20 = vpack.c.bf16 %v4370_v59, %v4354_v53  ;;  %v5127_v59 = vld [vmem:[#allocation12_spill] sm:$0xff] }
 0x1ca   : > { %v1672_v57 = vadd.f32 %v4135_v16, %v1636_v50 }
 0x1cc   : > { %v1704_v23 = vmax.f32 %v1672_v57, 0.0 }
 0x1ce   : > { %v1736_v24 = vrot.slane %v1704_v23, 7  ;;  %v1832_v41 = vrot.slane %v1704_v23, 1 }
 0x1cf   : > { %v1579_v7 = vpop.f32.mrf.mxu2 }
 0x1d0   : > { %v1637_v62 = vadd.f32 %v1579_v7, %v1411_v28  ;;  %v1867_v30 = vsel %vm5058_vm5, %v1831_v39, %v1832_v41  ;;  %v4383_v17 = vsel %vm5060_vm4, %v1735_v60, %v1736_v24  ;;  %v4390_v7 = vpop.f32.mrf.mxu3  ;;  %vm5066_vm5 = vmmov %vm5061_vm0 }
 0x1d1   : > { %v3116_v31 = vpack.c.bf16 %v1867_v30, %v1868_v8  ;;  %v3189_v30 = vld [vmem:[#allocation7 + $0x28] sm:$0xff] }
 0x1d2   : > { %v1673_v26 = vadd.f32 %v4135_v16, %v1637_v62  ;;  %2165 = vmatpush.bf16.msrb.mxu0 %v3189_v30 }
 0x1d3   : > { %3117 = vmatmul.msk.bf16.gmra.mxu1 %vm4087_vm11, %v3116_v31  ;;  %vm5062_vm11 = vmmov %vm5059_vm2 }
 0x1d4   : > { %v1705_v50 = vmax.f32 %v1673_v26, 0.0 }
 0x1d6   : > { %v1737_v58 = vrot.slane %v1705_v50, 7  ;;  %v1953_v57 = vpack.c.bf16 %v1705_v50, %v1704_v23  ;;  %v1833_v46 = vrot.slane %v1705_v50, 1 }
 0x1d7   : > { %v1582_v28 = vpop.f32.mrf.mxu2 }
 0x1d8   : > { %v1638_v19 = vadd.f32 %v1582_v28, %v1414_v51  ;;  %2069 = vmatmul.bf16.gmra.mxu3 %v1953_v57  ;;  %v4394_v60 = vsel %vm5061_vm0, %v1736_v24, %v1737_v58  ;;  %v1866_v24 = vsel %vm5063_vm13, %v1832_v41, %v1833_v46  ;;  %v4409_v57 = vpop.f32.mrf.mxu3  ;;  %v1419_v28 = vadd.f32 %v4228_v45, %v3949_v54 }
 0x1d9   : > { %v3024_v39 = vpack.c.bf16 %v4394_v60, %v4383_v17  ;;  %v1421_v45 = vadd.f32 %v4254_v6, %v3962_v3  ;;  %v1424_v6 = vadd.f32 %v4271_v55, %v3979_v43  ;;  %v3333_v17 = vld [vmem:[%s3668_s16] sm:$0xff] }
 0x1da   : > { %v1674_v22 = vadd.f32 %v4135_v16, %v1638_v19 }
 0x1dc   : > { %v1706_v62 = vmax.f32 %v1674_v22, 0.0 }
 0x1de   : > { %v1738_v21 = vrot.slane %v1706_v62, 7  ;;  %v1834_v23 = vrot.slane %v1706_v62, 1 }
 0x1df   : > { %v1584_v8 = vpop.f32.mrf.mxu2 }
 0x1e0   : > { %v1639_v31 = vadd.f32 %v1584_v8, %v1416_v10  ;;  %v1865_v26 = vsel %vm5062_vm11, %v1833_v46, %v1834_v23  ;;  %v4407_v51 = vsel %vm5064_vm7, %v1737_v58, %v1738_v21  ;;  %vm5071_vm11 = vmmov %vm5061_vm0 }
 0x1e1   : > { %v3120_v50 = vpack.c.bf16 %v1865_v26, %v1866_v24  ;;  %v3188_v24 = vld [vmem:[#allocation7 + $0x20] sm:$0xff]  ;;  %vm5073_vm7 = vmmov %vm5061_vm0 }
 0x1e2   : > { %v1675_v27 = vadd.f32 %v4135_v16, %v1639_v31  ;;  %v4425_v31 = vpop.f32.mrf.mxu3  ;;  %2166 = vmatpush.bf16.msrb.mxu0 %v3188_v24  ;;  %v1426_v24 = vadd.f32 %v4295_v34, %v3992_v63  ;;  %v1429_v34 = vadd.f32 %v4311_v36, %v4009_v42 }
 0x1e3   : > { %3121 = vmatmul.msk.bf16.gmra.mxu1 %vm4105_vm3, %v3120_v50  ;;  %vm5067_vm3 = vmmov %vm5059_vm2 }
 0x1e4   : > { %v1707_v40 = vmax.f32 %v1675_v27, 0.0  ;;  %vm5068_vm2 = vmmov %vm5061_vm0 }
 0x1e5   : > { %vm5069_vm4 = vmmov %vm5067_vm3 }
 0x1e6   : > { %v1739_v19 = vrot.slane %v1707_v40, 7  ;;  %v1835_v22 = vrot.slane %v1707_v40, 1  ;;  %v1954_v41 = vpack.c.bf16 %v1707_v40, %v1706_v62  ;;  %vm5072_vm13 = vmmov %vm5067_vm3 }
 0x1e7   : > { %v1587_v46 = vpop.f32.mrf.mxu2 }
 0x1e8   : > { %v1640_v10 = vadd.f32 %v1587_v46, %v1419_v28  ;;  %2074 = vmatmul.bf16.gmra.mxu3 %v1954_v41  ;;  %v1864_v58 = vsel %vm5065_vm12, %v1834_v23, %v1835_v22  ;;  %v4420_v30 = vsel %vm5066_vm5, %v1738_v21, %v1739_v19  ;;  %vm5075_vm12 = vmmov %vm5061_vm0  ;;  %vm5076_vm5 = vnez %v5021_v25 }
 0x1e9   : > { %v3028_v52 = vpack.c.bf16 %v4420_v30, %v4407_v51 }
 0x1ea   : > { %v1676_v8 = vadd.f32 %v4135_v16, %v1640_v10  ;;  %v4440_v41 = vpop.f32.mrf.mxu3 }
 0x1ec   : > { %v1708_v54 = vmax.f32 %v1676_v8, 0.0 }
 0x1ee   : > { %v1740_v62 = vrot.slane %v1708_v54, 7  ;;  %v1836_v26 = vrot.slane %v1708_v54, 1 }
 0x1ef   : > { %v1589_v50 = vpop.f32.mrf.mxu2 }
 0x1f0   : > { %v1641_v23 = vadd.f32 %v1589_v50, %v1421_v45  ;;  %v1863_v21 = vsel %vm5067_vm3, %v1835_v22, %v1836_v26  ;;  %v4433_v27 = vsel %vm5068_vm2, %v1739_v19, %v1740_v62  ;;  %vm5078_vm2 = vmmov %vm5061_vm0 }
 0x1f1   : > { %v3124_v40 = vpack.c.bf16 %v1863_v21, %v1864_v58 }
 0x1f2   : > { %v1677_v28 = vadd.f32 %v4135_v16, %v1641_v23  ;;  %v3187_v23 = vld [vmem:[#allocation7 + $0x18] sm:$0xff] }
 0x1f3   : > { %3125 = vmatmul.msk.bf16.gmra.mxu1 %vm4123_vm15, %v3124_v40  ;;  %v4453_v40 = vpop.f32.mrf.mxu3  ;;  %vm5070_vm15 = vmmov %vm5067_vm3  ;;  %2167 = vmatpush.bf16.msrb.mxu0 %v3187_v23 }
 0x1f4   : > { %v1709_v3 = vmax.f32 %v1677_v28, 0.0 }
 0x1f6   : > { %v1741_v46 = vrot.slane %v1709_v3, 7  ;;  %v1837_v10 = vrot.slane %v1709_v3, 1  ;;  %v1955_v22 = vpack.c.bf16 %v1709_v3, %v1708_v54 }
 0x1f7   : > { %v1592_v8 = vpop.f32.mrf.mxu2 }
 0x1f8   : > { %v1642_v45 = vadd.f32 %v1592_v8, %v1424_v6  ;;  %2079 = vmatmul.bf16.gmra.mxu3 %v1955_v22  ;;  %v1862_v19 = vsel %vm5069_vm4, %v1836_v26, %v1837_v10  ;;  %v4446_v58 = vsel %vm5061_vm0, %v1740_v62, %v1741_v46 }
 0x1f9   : > { %v3032_v15 = vpack.c.bf16 %v4446_v58, %v4433_v27 }
 0x1fa   : > { %v1678_v43 = vadd.f32 %v4135_v16, %v1642_v45 }
 0x1fc   : > { %v1710_v55 = vmax.f32 %v1678_v43, 0.0 }
 0x1fe   : > { %v1742_v54 = vrot.slane %v1710_v55, 7  ;;  %v1838_v50 = vrot.slane %v1710_v55, 1 }
 0x1ff   : > { %v1594_v21 = vpop.f32.mrf.mxu2 }
 0x200   : > { %v1643_v26 = vadd.f32 %v1594_v21, %v1426_v24  ;;  %v1861_v62 = vsel %vm5070_vm15, %v1837_v10, %v1838_v50  ;;  %v4459_v28 = vsel %vm5071_vm11, %v1741_v46, %v1742_v54  ;;  %v4474_v24 = vpop.f32.mrf.mxu3  ;;  %vm5081_vm11 = vmmov %vm5061_vm0 }
 0x201   : > { %v3128_v3 = vpack.c.bf16 %v1861_v62, %v1862_v19 }
 0x202   : > { %v1679_v6 = vadd.f32 %v4135_v16, %v1643_v26  ;;  %v3186_v26 = vld [vmem:[#allocation7 + $0x10] sm:$0xff] }
 0x203   : > { %3129 = vmatmul.msk.bf16.gmra.mxu1 %vm4143_vm1, %v3128_v3  ;;  %vm5074_vm1 = vmmov %vm5067_vm3  ;;  %2168 = vmatpush.bf16.msrb.mxu0 %v3186_v26 }
 0x204   : > { %v1711_v63 = vmax.f32 %v1679_v6, 0.0  ;;  %vm5077_vm3 = vmmov %vm5074_vm1 }
 0x205   : > { %vm5079_vm4 = vmmov %vm5074_vm1 }
 0x206   : > { %v1743_v22 = vrot.slane %v1711_v63, 7  ;;  %v1839_v8 = vrot.slane %v1711_v63, 1  ;;  %v1956_v45 = vpack.c.bf16 %v1711_v63, %v1710_v55  ;;  %v1431_v55 = vadd.f32 %v4339_v38, %v4022_v32  ;;  %vm5080_vm15 = vmmov %vm5074_vm1 }
 0x207   : > { %v1597_v43 = vpop.f32.mrf.mxu2  ;;  %v1434_v38 = vadd.f32 %v4364_v5, %v4039_v1  ;;  %v4503_v5 = vpop.f32.mrf.mxu1 }
 0x208   : > { %v1644_v10 = vadd.f32 %v1597_v43, %v1429_v34  ;;  %2084 = vmatmul.bf16.gmra.mxu3 %v1956_v45  ;;  %v1860_v46 = vsel %vm5072_vm13, %v1838_v50, %v1839_v8  ;;  %v4470_v19 = vsel %vm5073_vm7, %v1742_v54, %v1743_v22  ;;  %v4485_v63 = vpop.f32.mrf.mxu3  ;;  %vm5083_vm13 = vmmov %vm5061_vm0 }
 0x209   : > { %v3036_v49 = vpack.c.bf16 %v4470_v19, %v4459_v28  ;;  %vm5084_vm7 = vmmov %vm5074_vm1  ;;  %v3338_v19 = vld [vmem:[%s3668_s16 + $0x28] sm:$0xff] }
 0x20a   : > { %v1680_v42 = vadd.f32 %v4135_v16, %v1644_v10 }
 0x20c   : > { %v1712_v36 = vmax.f32 %v1680_v42, 0.0 }
 0x20e   : > { %v1744_v23 = vrot.slane %v1712_v36, 7  ;;  %v1840_v21 = vrot.slane %v1712_v36, 1 }
 0x20f   : > { %v1599_v62 = vpop.f32.mrf.mxu2 }
 0x210   : > { %v1645_v50 = vadd.f32 %v1599_v62, %v1431_v55  ;;  %v1859_v54 = vsel %vm5074_vm1, %v1839_v8, %v1840_v21  ;;  %v4483_v3 = vsel %vm5075_vm12, %v1743_v22, %v1744_v23  ;;  %v4501_v26 = vpop.f32.mrf.mxu3  ;;  %vm5087_vm12 = vmmov %vm5061_vm0 }
 0x211   : > { %v3132_v6 = vpack.c.bf16 %v1859_v54, %v1860_v46 }
 0x212   : > { %v1681_v34 = vadd.f32 %v4135_v16, %v1645_v50 }
 0x213   : > { %3133 = vmatmul.msk.bf16.gmra.mxu1 %vm5076_vm5, %v3132_v6  ;;  %vm5089_vm5 = vmmov %vm5077_vm3 }
 0x214   : > { %v1713_v32 = vmax.f32 %v1681_v34, 0.0 }
 0x216   : > { %v1745_v45 = vrot.slane %v1713_v32, 7  ;;  %v1841_v43 = vrot.slane %v1713_v32, 1  ;;  %v1957_v8 = vpack.c.bf16 %v1713_v32, %v1712_v36  ;;  %v1436_v36 = vadd.f32 %v4375_v0, %v4052_v37 }
 0x217   : > { %v1602_v10 = vpop.f32.mrf.mxu2  ;;  %v1439_v0 = vadd.f32 %v4390_v7, %v4071_v18 }
 0x218   : > { %v1646_v42 = vadd.f32 %v1602_v10, %v1434_v38  ;;  %2089 = vmatmul.bf16.gmra.mxu3 %v1957_v8  ;;  %v1858_v22 = vsel %vm5077_vm3, %v1840_v21, %v1841_v43  ;;  %v4496_v46 = vsel %vm5078_vm2, %v1744_v23, %v1745_v45  ;;  %v3185_v21 = vld [vmem:[#allocation7 + $0x8] sm:$0xff]  ;;  %v4518_v8 = vpop.f32.mrf.mxu3  ;;  %vm5093_vm2 = vmmov %vm5061_vm0 }
 0x219   : > { %2169 = vmatpush.bf16.msrb.mxu0 %v3185_v21 }
 0x21a   : > { %v1682_v55 = vadd.f32 %v4135_v16, %v1646_v42 }
 0x21c   : > { %v1714_v1 = vmax.f32 %v1682_v55, 0.0  ;;  %v4520_v55 = vpop.f32.mrf.mxu1 }
 0x21e   : > { %v1746_v62 = vrot.slane %v1714_v1, 7  ;;  %v1842_v50 = vrot.slane %v1714_v1, 1 }
 0x21f   : > { %v1604_v54 = vpop.f32.mrf.mxu2 }
 0x220   : > { %v1647_v6 = vadd.f32 %v1604_v54, %v1436_v36  ;;  %v1857_v23 = vsel %vm5079_vm4, %v1841_v43, %v1842_v50  ;;  %v4511_v34 = vsel %vm5061_vm0, %v1745_v45, %v1746_v62 }
 0x221   : > { %v3136_v32 = vpack.c.bf16 %v1857_v23, %v1858_v22  ;;  %v3184_v23 = vld [vmem:[#allocation7] sm:$0xff] }
 0x222   : > { %v1683_v38 = vadd.f32 %v4135_v16, %v1647_v6  ;;  %2170 = vmatpush.bf16.msrb.mxu0 %v3184_v23 }
 0x223   : > { %3137 = vmatmul.msk.bf16.gmra.mxu1 %vm4216_vm6, %v3136_v32  ;;  %vm5082_vm6 = vmmov %vm5074_vm1 }
 0x224   : > { %v1715_v37 = vmax.f32 %v1683_v38, 0.0  ;;  %v4533_v38 = vpop.f32.mrf.mxu3  ;;  %vm5085_vm1 = vmmov %vm5061_vm0 }
 0x226   : > { %v1747_v10 = vrot.slane %v1715_v37, 7  ;;  %v1843_v42 = vrot.slane %v1715_v37, 1  ;;  %v1958_v43 = vpack.c.bf16 %v1715_v37, %v1714_v1  ;;  %v1441_v1 = vadd.f32 %v4409_v57, %v4084_v13 }
 0x227   : > { %v1607_v36 = vpop.f32.mrf.mxu2 }
 0x228   : > { %v1648_v45 = vadd.f32 %v1607_v36, %v1439_v0  ;;  %2094 = vmatmul.bf16.gmra.mxu3 %v1958_v43  ;;  %v1856_v22 = vsel %vm5080_vm15, %v1842_v50, %v1843_v42  ;;  %v4526_v12 = vsel %vm5081_vm11, %v1746_v62, %v1747_v10  ;;  %v4541_v0 = vpop.f32.mrf.mxu1  ;;  %v1444_v36 = vadd.f32 %v4425_v31, %v4094_v61 }
 0x22a   : > { %v1684_v7 = vadd.f32 %v4135_v16, %v1648_v45 }
 0x22c   : > { %v1716_v21 = vmax.f32 %v1684_v7, 0.0 }
 0x22e   : > { %v1748_v54 = vrot.slane %v1716_v21, 7  ;;  %v1844_v6 = vrot.slane %v1716_v21, 1 }
 0x22f   : > { %v1609_v32 = vpop.f32.mrf.mxu2 }
 0x230   : > { %v1649_v50 = vadd.f32 %v1609_v32, %v1441_v1  ;;  %v1855_v62 = vsel %vm5082_vm6, %v1843_v42, %v1844_v6  ;;  %v4539_v37 = vsel %vm5083_vm13, %v1747_v10, %v1748_v54  ;;  %v4556_v32 = vpop.f32.mrf.mxu3  ;;  %v4559_v31 = vpop.f32.mrf.mxu1 }
 0x231   : > { %v3140_v43 = vpack.c.bf16 %v1855_v62, %v1856_v22 }
 0x232   : > { %v1685_v13 = vadd.f32 %v4135_v16, %v1649_v50  ;;  %v1446_v50 = vadd.f32 %v4440_v41, %v4102_v44 }
 0x233   : > { %3141 = vmatmul.msk.bf16.gmra.mxu1 %vm4250_vm10, %v3140_v43  ;;  %vm5086_vm10 = vmmov %vm5077_vm3 }
 0x234   : > { %v1717_v57 = vmax.f32 %v1685_v13, 0.0  ;;  %vm5090_vm3 = vmmov %vm5061_vm0 }
 0x236   : > { %v1749_v45 = vrot.slane %v1717_v57, 7  ;;  %v1845_v7 = vrot.slane %v1717_v57, 1  ;;  %v1959_v42 = vpack.c.bf16 %v1717_v57, %v1716_v21 }
 0x237   : > { %v1612_v1 = vpop.f32.mrf.mxu2 }
 0x238   : > { %v1650_v23 = vadd.f32 %v1612_v1, %v1444_v36  ;;  %2099 = vmatmul.bf16.gmra.mxu3 %v1959_v42  ;;  %v1854_v10 = vsel %vm5084_vm7, %v1844_v6, %v1845_v7  ;;  %v4552_v22 = vsel %vm5085_vm1, %v1748_v54, %v1749_v45  ;;  %v4572_v1 = vpop.f32.mrf.mxu3  ;;  %v4574_v41 = vpop.f32.mrf.mxu1 }
 0x23a   : > { %v1686_v61 = vadd.f32 %v4135_v16, %v1650_v23  ;;  %v5088_v23 = vld [vmem:[#allocation28_spill] sm:$0xff] }
 0x23c   : > { %v1718_v21 = vmax.f32 %v1686_v61, 0.0  ;;  %v1449_v61 = vadd.f32 %v4453_v40, %v5088_v23  ;;  %v5091_v40 = vld [vmem:[#allocation29_spill] sm:$0xff] }
 0x23e   : > { %v1750_v62 = vrot.slane %v1718_v21, 7  ;;  %v1846_v43 = vrot.slane %v1718_v21, 1 }
 0x23f   : > { %v1614_v6 = vpop.f32.mrf.mxu2 }
 0x240   : > { %v1651_v13 = vadd.f32 %v1614_v6, %v1446_v50  ;;  %v1853_v54 = vsel %vm5086_vm10, %v1845_v7, %v1846_v43  ;;  %v4567_v57 = vsel %vm5087_vm12, %v1749_v45, %v1750_v62  ;;  %v4591_v23 = vpop.f32.mrf.mxu1 }
 0x241   : > { %v3144_v36 = vpack.c.bf16 %v1853_v54, %v1854_v10 }
 0x242   : > { %v1687_v42 = vadd.f32 %v4135_v16, %v1651_v13 }
 0x243   : > { %3145 = vmatmul.msk.bf16.gmra.mxu1 %vm4286_vm8, %v3144_v36  ;;  %vm5092_vm8 = vmmov %vm5079_vm4 }
 0x244   : > { %v1719_v44 = vmax.f32 %v1687_v42, 0.0  ;;  %v1451_v42 = vadd.f32 %v4474_v24, %v5091_v40  ;;  %vm5096_vm4 = vmmov %vm5061_vm0 }
 0x245   : > { %vm5097_vm0 = vmmov %vm5089_vm5 }
 0x246   : > { %v1751_v50 = vrot.slane %v1719_v44, 7  ;;  %v1847_v7 = vrot.slane %v1719_v44, 1  ;;  %v1960_v6 = vpack.c.bf16 %v1719_v44, %v1718_v21  ;;  %v4589_v21 = vpop.f32.mrf.mxu3  ;;  %vm5099_vm15 = vmmov %vm5097_vm0 }
 0x247   : > { %v1617_v48 = vpop.f32.mrf.mxu2 }
 0x248   : > { %v1652_v45 = vadd.f32 %v1617_v48, %v1449_v61  ;;  %2104 = vmatmul.bf16.gmra.mxu3 %v1960_v6  ;;  %v1852_v10 = vsel %vm5089_vm5, %v1846_v43, %v1847_v7  ;;  %v4582_v56 = vsel %vm5090_vm3, %v1750_v62, %v1751_v50  ;;  %vm5128_vm5 = vnez %v5127_v59 }
 0x24a   : > { %v1688_v54 = vadd.f32 %v4135_v16, %v1652_v45 }
 0x24c   : > { %v1720_v36 = vmax.f32 %v1688_v54, 0.0 }
 0x24e   : > { %v1752_v48 = vrot.slane %v1720_v36, 7  ;;  %v1848_v44 = vrot.slane %v1720_v36, 1  ;;  %v4602_v25 = vpop.f32.mrf.mxu3 }
 0x24f   : > { %v1619_v43 = vpop.f32.mrf.mxu2 }
 0x250   : > { %v1653_v61 = vadd.f32 %v1619_v43, %v1451_v42  ;;  %v1851_v62 = vsel %vm5092_vm8, %v1847_v7, %v1848_v44  ;;  %v4597_v6 = vsel %vm5093_vm2, %v1751_v50, %v1752_v48  ;;  %v5094_v42 = vld [vmem:[#allocation30_spill] sm:$0xff] }
 0x251   : > { %v3148_v45 = vpack.c.bf16 %v1851_v62, %v1852_v10  ;;  %v5095_v43 = vrot.slane %v5094_v42, 7 }
 0x252   : > { %v1689_v54 = vadd.f32 %v4135_v16, %v1653_v61  ;;  %v5098_v16 = vrot.slane %v5094_v42, 1  ;;  %v5111_v42 = vld [vmem:[#allocation33_spill] sm:$0xff] }
 0x253   : > { %3149 = vmatmul.msk.bf16.gmra.mxu1 %vm4322_vm14, %v3148_v45  ;;  %vm5100_vm14 = vmmov %vm5085_vm1 }
 0x254   : > { %v1721_v24 = vmax.f32 %v1689_v54, 0.0  ;;  %v5102_v54 = vld [vmem:[#allocation19_spill] sm:$0xff] }
 0x255   : > { %vm5103_vm11 = vnez %v5102_v54 }
 0x256   : > { %v1753_v40 = vrot.slane %v1721_v24, 7  ;;  %v1849_v13 = vrot.slane %v1721_v24, 1  ;;  %v1961_v18 = vpack.c.bf16 %v1721_v24, %v1720_v36  ;;  %v4618_v36 = vpop.f32.mrf.mxu1  ;;  %v5108_v24 = vpack.c.bf16 %v4232_v29, %v4213_v14  ;;  %v5121_v14 = vld [vmem:[#allocation25_spill] sm:$0xff]  ;;  %v5123_v29 = vld [vmem:[#allocation26_spill] sm:$0xff] }
 0x257   : > { %vm5122_vm1 = vnez %v5121_v14  ;;  %vm5124_vm10 = vnez %v5123_v29 }
 0x258   : > { %2109 = vmatmul.bf16.gmra.mxu3 %v1961_v18  ;;  %v1785_v7 = vsel %vm5096_vm4, %v1753_v40, %v5095_v43  ;;  %v1850_v50 = vsel %vm5097_vm0, %v1848_v44, %v1849_v13  ;;  %v1881_v35 = vsel %vm5099_vm15, %v1849_v13, %v5098_v16  ;;  %v4616_v10 = vsel %vm5100_vm14, %v1752_v48, %v1753_v40  ;;  %v5101_v18 = vld [vmem:[#allocation31_spill] sm:$0xff]  ;;  %v5106_v48 = vld [vmem:[#allocation21_spill] sm:$0xff]  ;;  %v5109_v40 = vld [vmem:[#allocation22_spill] sm:$0xff] }
 0x259   : > { %v2996_v61 = vpack.c.bf16 %v5101_v18, %v1785_v7  ;;  %v3152_v62 = vpack.c.bf16 %v1881_v35, %v1850_v50  ;;  %v3056_v45 = vpack.c.bf16 %v4616_v10, %v4597_v6  ;;  %v5105_v13 = vpack.c.bf16 %v4196_v33, %v5104_v11  ;;  %v5113_v7 = vld [vmem:[#allocation23_spill] sm:$0xff]  ;;  %v5116_v50 = vld [vmem:[#allocation24_spill] sm:$0xff]  ;;  %v5119_v16 = vld [vmem:[#allocation34_spill] sm:$0xff] }
 0x25a   : > { %vm5107_vm6 = vnez %v5106_v48  ;;  %vm5110_vm13 = vnez %v5109_v40  ;;  %v5112_v43 = vpack.c.bf16 %v4266_v9, %v5111_v42  ;;  %vm5114_vm7 = vnez %v5113_v7  ;;  %v5118_v33 = vld [vmem:[#allocation35_spill] sm:$0xff]  ;;  %v4668_v18 = vld [vmem:[%s4863_s4] ss:$0 sm:$0xff]  ;;  %v5129_v48 = vld [vmem:[#allocation13_spill] sm:$0xff] }
 0x25b   : > { %2997 = vmatmul.msk.bf16.vlgmr.msrb.gmra.mxu0 %vm5103_vm11, %v2996_v61  ;;  %v5120_v35 = vpack.c.bf16 %v5118_v33, %v5119_v16  ;;  %v5125_v9 = vld [vmem:[#allocation27_spill] sm:$0xff]  ;;  %vm5130_vm3 = vnez %v5129_v48  ;;  %v3335_v40 = vld [vmem:[%s3668_s16 + $0x10] sm:$0xff] }
 0x25c   : > { %vm5126_vm12 = vnez %v5125_v9  ;;  %v3337_v9 = vld [vmem:[%s3668_s16 + $0x20] sm:$0xff] }
 0x25e   : > { %v4625_v44 = vpop.f32.mrf.mxu1 }
 0x263   : > { %3153 = vmatmul.msk.bf16.gmra.mxu1 %vm4357_vm9, %v3152_v62  ;;  %vm5117_vm9 = vnez %v5116_v50  ;;  %v3336_v50 = vld [vmem:[%s3668_s16 + $0x18] sm:$0xff] }
 0x26b   : > { %3001 = vmatmul.msk.bf16.gmra.mxu0 %vm5107_vm6, %v5105_v13  ;;  %v2055_v13 = vpop.f32.mrf.mxu3 }
 0x27b   : > { %3005 = vmatmul.msk.bf16.gmra.mxu0 %vm5110_vm13, %v5108_v24 }
 0x28b   : > { %3009 = vmatmul.msk.bf16.gmra.mxu0 %vm5114_vm7, %v5112_v43 }
 0x29b   : > { %3013 = vmatmul.msk.bf16.gmra.mxu0 %vm5117_vm9, %v5115_v47  ;;  %v2057_v47 = vpop.f32.mrf.mxu3 }
 0x2a3   : > { %v2060_v29 = vpop.f32.mrf.mxu3 }
 0x2ab   : > { %3017 = vmatmul.msk.bf16.gmra.mxu0 %vm5122_vm1, %v5120_v35 }
 0x2bb   : > { %3021 = vmatmul.msk.bf16.gmra.mxu0 %vm5124_vm10, %v3020_v20 }
 0x2cb   : > { %3025 = vmatmul.msk.bf16.gmra.mxu0 %vm5126_vm12, %v3024_v39 }
 0x2d8   : > { %v2172_v4 = vpop.f32.mrf.mxu0 }
 0x2d9   : > { %v2173_v2 = vadd.f32 %v2172_v4, %v4485_v63 }
 0x2db   : > { %v2421_v53 = vadd.f32 %v4503_v5, %v2173_v2  ;;  %3029 = vmatmul.msk.bf16.gmra.mxu0 %vm5128_vm5, %v3028_v52  ;;  %v3334_v52 = vld [vmem:[%s3668_s16 + $0x8] sm:$0xff] }
 0x2dd   : > { %v2457_v20 = vadd.f32 %v4668_v18, %v2421_v53 }
 0x2df   : > { %v2489_v60 = vadd.f32 %v3333_v17, %v2457_v20 }
 0x2e0   : > { %v2174_v39 = vpop.f32.mrf.mxu0 }
 0x2e1   : > { %v2521_v61 = vmax.f32 %v2489_v60, 0.0  ;;  %v2175_v63 = vadd.f32 %v2174_v39, %v4501_v26 }
 0x2e3   : > { %2553 = vst [vmem:[%s4681_s11] sm:$0xff] %v2521_v61  ;;  %v2422_v51 = vadd.f32 %v4520_v55, %v2175_v63  ;;  %v2361_v55 = vpop.f32.mrf.mxu1 }
 0x2e5   : > { %v2458_v30 = vadd.f32 %v4668_v18, %v2422_v51  ;;  %v5134_v51 = vld [vmem:[#allocation15_spill] sm:$0xff] }
 0x2e6   : > { %vm5135_vm2 = vnez %v5134_v51  ;;  %v5142_v51 = vpack.c.bf16 %v4582_v56, %v4567_v57  ;;  %v3346_v57 = vld [vmem:[%s3668_s16 + $0x68] sm:$0xff] }
 0x2e7   : > { %v2490_v5 = vadd.f32 %v3334_v52, %v2458_v30  ;;  %v3339_v30 = vld [vmem:[%s3668_s16 + $0x30] sm:$0xff] }
 0x2e8   : > { %v2177_v62 = vpop.f32.mrf.mxu0 }
 0x2e9   : > { %v2522_v54 = vmax.f32 %v2490_v5, 0.0  ;;  %v2178_v11 = vadd.f32 %v2177_v62, %v4518_v8 }
 0x2eb   : > { %2554 = vst [vmem:[%s4681_s11 + $0x8] sm:$0xff] %v2522_v54  ;;  %v2423_v26 = vadd.f32 %v4541_v0, %v2178_v11  ;;  %3033 = vmatmul.msk.bf16.gmra.mxu0 %vm5130_vm3, %v3032_v15  ;;  %v2363_v58 = vpop.f32.mrf.mxu1 }
 0x2ed   : > { %v2459_v24 = vadd.f32 %v4668_v18, %v2423_v26 }
 0x2ef   : > { %v2491_v42 = vadd.f32 %v3335_v40, %v2459_v24 }
 0x2f0   : > { %v2179_v43 = vpop.f32.mrf.mxu0 }
 0x2f1   : > { %v2523_v7 = vmax.f32 %v2491_v42, 0.0  ;;  %v2180_v8 = vadd.f32 %v2179_v43, %v4533_v38  ;;  %v5131_v38 = vld [vmem:[#allocation14_spill] sm:$0xff]  ;;  %v5137_v43 = vld [vmem:[#allocation16_spill] sm:$0xff] }
 0x2f2   : > { %vm5132_vm8 = vnez %v5131_v38  ;;  %vm5138_vm4 = vnez %v5137_v43  ;;  %v3347_v43 = vld [vmem:[%s3668_s16 + $0x70] sm:$0xff] }
 0x2f3   : > { %2555 = vst [vmem:[%s4681_s11 + $0x10] sm:$0xff] %v2523_v7  ;;  %v2424_v0 = vadd.f32 %v4559_v31, %v2180_v8  ;;  %v2366_v2 = vpop.f32.mrf.mxu1 }
 0x2f5   : > { %v2460_v27 = vadd.f32 %v4668_v18, %v2424_v0  ;;  %v3341_v0 = vld [vmem:[%s3668_s16 + $0x40] sm:$0xff] }
 0x2f7   : > { %v2492_v15 = vadd.f32 %v3336_v50, %v2460_v27 }
 0x2f8   : > { %v2182_v33 = vpop.f32.mrf.mxu0 }
 0x2f9   : > { %v2524_v16 = vmax.f32 %v2492_v15, 0.0  ;;  %v2183_v35 = vadd.f32 %v2182_v33, %v4556_v32 }
 0x2fb   : > { %2556 = vst [vmem:[%s4681_s11 + $0x18] sm:$0xff] %v2524_v16  ;;  %v2425_v14 = vadd.f32 %v4574_v41, %v2183_v35  ;;  %3037 = vmatmul.msk.bf16.gmra.mxu0 %vm5132_vm8, %v3036_v49  ;;  %v2062_v49 = vpop.f32.mrf.mxu3  ;;  %v2368_v61 = vpop.f32.mrf.mxu1 }
 0x2fd   : > { %v2461_v31 = vadd.f32 %v4668_v18, %v2425_v14 }
 0x2ff   : > { %v2493_v4 = vadd.f32 %v3337_v9, %v2461_v31 }
 0x300   : > { %v2184_v53 = vpop.f32.mrf.mxu0 }
 0x301   : > { %v2525_v59 = vmax.f32 %v2493_v4, 0.0  ;;  %v2185_v32 = vadd.f32 %v2184_v53, %v4572_v1  ;;  %v5133_v1 = vpack.c.bf16 %v4496_v46, %v4483_v3  ;;  %v3340_v46 = vld [vmem:[%s3668_s16 + $0x38] sm:$0xff]  ;;  %v5139_v4 = vpack.c.bf16 %v4552_v22, %v4539_v37  ;;  %v5140_v53 = vld [vmem:[#allocation17_spill] sm:$0xff] }
 0x302   : > { %vm5141_vm0 = vnez %v5140_v53 }
 0x303   : > { %2557 = vst [vmem:[%s4681_s11 + $0x20] sm:$0xff] %v2525_v59  ;;  %v2426_v41 = vadd.f32 %v4591_v23, %v2185_v32  ;;  %v2065_v54 = vpop.f32.mrf.mxu3  ;;  %v2371_v11 = vpop.f32.mrf.mxu1 }
 0x305   : > { %v2462_v28 = vadd.f32 %v4668_v18, %v2426_v41 }
 0x307   : > { %v2494_v20 = vadd.f32 %v3338_v19, %v2462_v28 }
 0x308   : > { %v2187_v17 = vpop.f32.mrf.mxu0 }
 0x309   : > { %v2526_v60 = vmax.f32 %v2494_v20, 0.0  ;;  %v2188_v39 = vadd.f32 %v2187_v17, %v4589_v21  ;;  %v3344_v17 = vld [vmem:[%s3668_s16 + $0x58] sm:$0xff] }
 0x30b   : > { %2558 = vst [vmem:[%s4681_s11 + $0x28] sm:$0xff] %v2526_v60  ;;  %v2427_v63 = vadd.f32 %v4618_v36, %v2188_v39  ;;  %3041 = vmatmul.msk.bf16.gmra.mxu0 %vm5135_vm2, %v5133_v1  ;;  %v2067_v7 = vpop.f32.mrf.mxu3  ;;  %v2373_v8 = vpop.f32.mrf.mxu1 }
 0x30d   : > { %v2463_v23 = vadd.f32 %v4668_v18, %v2427_v63 }
 0x30f   : > { %v2495_v52 = vadd.f32 %v3339_v30, %v2463_v23  ;;  %v3345_v30 = vld [vmem:[%s3668_s16 + $0x60] sm:$0xff] }
 0x310   : > { %v2189_v5 = vpop.f32.mrf.mxu0 }
 0x311   : > { %v2527_v62 = vmax.f32 %v2495_v52, 0.0  ;;  %v2190_v21 = vadd.f32 %v2189_v5, %v4602_v25  ;;  %v5136_v25 = vpack.c.bf16 %v4526_v12, %v4511_v34  ;;  %v3342_v34 = vld [vmem:[%s3668_s16 + $0x48] sm:$0xff] }
 0x313   : > { %2559 = vst [vmem:[%s4681_s11 + $0x30] sm:$0xff] %v2527_v62  ;;  %v2428_v36 = vadd.f32 %v4625_v44, %v2190_v21  ;;  %v2070_v16 = vpop.f32.mrf.mxu3  ;;  %v2376_v35 = vpop.f32.mrf.mxu1 }
 0x315   : > { %v2464_v3 = vadd.f32 %v4668_v18, %v2428_v36 }
 0x317   : > { %v2496_v26 = vadd.f32 %v3340_v46, %v2464_v3 }
 0x318   : > { %v2192_v48 = vpop.f32.mrf.mxu0 }
 0x319   : > { %v2528_v24 = vmax.f32 %v2496_v26, 0.0  ;;  %v2193_v40 = vadd.f32 %v2192_v48, %v2055_v13 }
 0x31b   : > { %2560 = vst [vmem:[%s4681_s11 + $0x38] sm:$0xff] %v2528_v24  ;;  %v2429_v42 = vadd.f32 %v2361_v55, %v2193_v40  ;;  %3045 = vmatmul.msk.bf16.gmra.mxu0 %vm5138_vm4, %v5136_v25  ;;  %v2072_v32 = vpop.f32.mrf.mxu3  ;;  %v2378_v20 = vpop.f32.mrf.mxu1  ;;  %v5145_v40 = vld [vmem:[#allocation20_spill] sm:$0xff] }
 0x31c   : > { %vm5146_vm14 = vnez %v5145_v40  ;;  %v3354_v40 = vld [vmem:[%s3668_s16 + $0xa8] sm:$0xff] }
 0x31d   : > { %v2465_v44 = vadd.f32 %v4668_v18, %v2429_v42 }
 0x31f   : > { %v2497_v27 = vadd.f32 %v3341_v0, %v2465_v44 }
 0x320   : > { %v2194_v50 = vpop.f32.mrf.mxu0 }
 0x321   : > { %v2529_v15 = vmax.f32 %v2497_v27, 0.0  ;;  %v2195_v13 = vadd.f32 %v2194_v50, %v2057_v47 }
 0x323   : > { %2561 = vst [vmem:[%s4681_s11 + $0x40] sm:$0xff] %v2529_v15  ;;  %v2430_v33 = vadd.f32 %v2363_v58, %v2195_v13  ;;  %v3343_v58 = vld [vmem:[%s3668_s16 + $0x50] sm:$0xff]  ;;  %v2075_v63 = vpop.f32.mrf.mxu3  ;;  %v2381_v23 = vpop.f32.mrf.mxu1  ;;  %v3348_v13 = vld [vmem:[%s3668_s16 + $0x78] sm:$0xff] }
 0x325   : > { %v2466_v55 = vadd.f32 %v4668_v18, %v2430_v33 }
 0x327   : > { %v2498_v12 = vadd.f32 %v3342_v34, %v2466_v55 }
 0x328   : > { %v2197_v14 = vpop.f32.mrf.mxu0 }
 0x329   : > { %v2530_v38 = vmax.f32 %v2498_v12, 0.0  ;;  %v2198_v31 = vadd.f32 %v2197_v14, %v2060_v29 }
 0x32b   : > { %2562 = vst [vmem:[%s4681_s11 + $0x48] sm:$0xff] %v2530_v38  ;;  %v2431_v9 = vadd.f32 %v2366_v2, %v2198_v31  ;;  %3049 = vmatmul.msk.bf16.gmra.mxu0 %vm5141_vm0, %v5139_v4  ;;  %v2077_v36 = vpop.f32.mrf.mxu3  ;;  %v2383_v3 = vpop.f32.mrf.mxu1 }
 0x32d   : > { %v2467_v47 = vadd.f32 %v4668_v18, %v2431_v9 }
 0x32f   : > { %v2499_v59 = vadd.f32 %v3343_v58, %v2467_v47 }
 0x330   : > { %v2199_v41 = vpop.f32.mrf.mxu0 }
 0x331   : > { %v2531_v28 = vmax.f32 %v2499_v59, 0.0  ;;  %v2200_v19 = vadd.f32 %v2199_v41, %v2062_v49  ;;  %v5143_v49 = vld [vmem:[#allocation18_spill] sm:$0xff]  ;;  %v3350_v59 = vld [vmem:[%s3668_s16 + $0x88] sm:$0xff] }
 0x332   : > { %vm5144_vm15 = vnez %v5143_v49 }
 0x333   : > { %2563 = vst [vmem:[%s4681_s11 + $0x50] sm:$0xff] %v2531_v28  ;;  %v2432_v29 = vadd.f32 %v2368_v61, %v2200_v19  ;;  %v2080_v25 = vpop.f32.mrf.mxu3  ;;  %v2386_v44 = vpop.f32.mrf.mxu1 }
 0x335   : > { %v2468_v2 = vadd.f32 %v4668_v18, %v2432_v29 }
 0x337   : > { %v2500_v37 = vadd.f32 %v3344_v17, %v2468_v2 }
 0x338   : > { %v2202_v22 = vpop.f32.mrf.mxu0 }
 0x339   : > { %v2532_v60 = vmax.f32 %v2500_v37, 0.0  ;;  %v2203_v39 = vadd.f32 %v2202_v22, %v2065_v54  ;;  %v3351_v37 = vld [vmem:[%s3668_s16 + $0x90] sm:$0xff] }
 0x33b   : > { %2564 = vst [vmem:[%s4681_s11 + $0x58] sm:$0xff] %v2532_v60  ;;  %v2433_v1 = vadd.f32 %v2371_v11, %v2203_v39  ;;  %3053 = vmatmul.msk.bf16.gmra.mxu0 %vm5144_vm15, %v5142_v51  ;;  %v2082_v10 = vpop.f32.mrf.mxu3 }
 0x33d   : > { %v2469_v61 = vadd.f32 %v4668_v18, %v2433_v1 }
 0x33f   : > { %v2501_v52 = vadd.f32 %v3345_v30, %v2469_v61 }
 0x340   : > { %v2204_v5 = vpop.f32.mrf.mxu0 }
 0x341   : > { %v2533_v62 = vmax.f32 %v2501_v52, 0.0  ;;  %v2205_v21 = vadd.f32 %v2204_v5, %v2067_v7 }
 0x343   : > { %2565 = vst [vmem:[%s4681_s11 + $0x60] sm:$0xff] %v2533_v62  ;;  %v2434_v54 = vadd.f32 %v2373_v8, %v2205_v21  ;;  %v2085_v4 = vpop.f32.mrf.mxu3 }
 0x345   : > { %v2470_v11 = vadd.f32 %v4668_v18, %v2434_v54 }
 0x347   : > { %v2502_v56 = vadd.f32 %v3346_v57, %v2470_v11 }
 0x348   : > { %v2207_v46 = vpop.f32.mrf.mxu0 }
 0x349   : > { %v2534_v26 = vmax.f32 %v2502_v56, 0.0  ;;  %v2208_v48 = vadd.f32 %v2207_v46, %v2070_v16  ;;  %v2388_v16 = vpop.f32.mrf.mxu1 }
 0x34b   : > { %2566 = vst [vmem:[%s4681_s11 + $0x68] sm:$0xff] %v2534_v26  ;;  %v2435_v24 = vadd.f32 %v2376_v35, %v2208_v48  ;;  %3057 = vmatmul.msk.bf16.gmra.mxu0 %vm5146_vm14, %v3056_v45  ;;  %v3349_v35 = vld [vmem:[%s3668_s16 + $0x80] sm:$0xff]  ;;  %v2087_v29 = vpop.f32.mrf.mxu3 }
 0x34d   : > { %v2471_v42 = vadd.f32 %v4668_v18, %v2435_v24 }
 0x34f   : > { %v2503_v7 = vadd.f32 %v3347_v43, %v2471_v42 }
 0x350   : > { %v2209_v8 = vpop.f32.mrf.mxu0 }
 0x351   : > { %v2535_v0 = vmax.f32 %v2503_v7, 0.0  ;;  %v2210_v27 = vadd.f32 %v2209_v8, %v2072_v32  ;;  %v2391_v47 = vpop.f32.mrf.mxu1 }
 0x353   : > { %2567 = vst [vmem:[%s4681_s11 + $0x70] sm:$0xff] %v2535_v0  ;;  %v2436_v50 = vadd.f32 %v2378_v20, %v2210_v27  ;;  %v2090_v49 = vpop.f32.mrf.mxu3 }
 0x355   : > { %v2472_v15 = vadd.f32 %v4668_v18, %v2436_v50  ;;  %v3355_v50 = vld [vmem:[%s3668_s16 + $0xb0] sm:$0xff] }
 0x357   : > { %v2504_v6 = vadd.f32 %v3348_v13, %v2472_v15 }
 0x358   : > { %v2212_v45 = vpop.f32.mrf.mxu0 }
 0x359   : > { %v2536_v33 = vmax.f32 %v2504_v6, 0.0  ;;  %v2213_v55 = vadd.f32 %v2212_v45, %v2075_v63  ;;  %v2393_v17 = vpop.f32.mrf.mxu1 }
 0x35b   : > { %2568 = vst [vmem:[%s4681_s11 + $0x78] sm:$0xff] %v2536_v33  ;;  %v2437_v34 = vadd.f32 %v2381_v23, %v2213_v55  ;;  %v3352_v23 = vld [vmem:[%s3668_s16 + $0x98] sm:$0xff] }
 0x35d   : > { %v2473_v12 = vadd.f32 %v4668_v18, %v2437_v34  ;;  %v3356_v34 = vld [vmem:[%s3668_s16 + $0xb8] sm:$0xff] }
 0x35f   : > { %v2505_v14 = vadd.f32 %v3349_v35, %v2473_v12 }
 0x360   : > { %v2214_v38 = vpop.f32.mrf.mxu0 }
 0x361   : > { %v2537_v31 = vmax.f32 %v2505_v14, 0.0  ;;  %v2215_v9 = vadd.f32 %v2214_v38, %v2077_v36  ;;  %v2396_v30 = vpop.f32.mrf.mxu1  ;;  %v3353_v36 = vld [vmem:[%s3668_s16 + $0xa0] sm:$0xff] }
 0x363   : > { %2569 = vst [vmem:[%s4681_s11 + $0x80] sm:$0xff] %v2537_v31  ;;  %v2438_v53 = vadd.f32 %v2383_v3, %v2215_v9  ;;  %v2092_v3 = vpop.f32.mrf.mxu3 }
 0x365   : > { %v2474_v58 = vadd.f32 %v4668_v18, %v2438_v53  ;;  %v3357_v53 = vld [vmem:[%s3668_s16 + $0xc0] sm:$0xff] }
 0x367   : > { %v2506_v32 = vadd.f32 %v3350_v59, %v2474_v58 }
 0x368   : > { %v2217_v41 = vpop.f32.mrf.mxu0 }
 0x369   : > { %v2538_v28 = vmax.f32 %v2506_v32, 0.0  ;;  %v2218_v19 = vadd.f32 %v2217_v41, %v2080_v25  ;;  %v2398_v26 = vpop.f32.mrf.mxu1 }
 0x36b   : > { %2570 = vst [vmem:[%s4681_s11 + $0x88] sm:$0xff] %v2538_v28  ;;  %v2439_v20 = vadd.f32 %v2386_v44, %v2218_v19  ;;  %v2095_v44 = vpop.f32.mrf.mxu3 }
 0x36d   : > { %v2475_v2 = vadd.f32 %v4668_v18, %v2439_v20  ;;  %v3358_v20 = vld [vmem:[%s3668_s16 + $0xc8] sm:$0xff] }
 0x36f   : > { %v2507_v22 = vadd.f32 %v3351_v37, %v2475_v2 }
 0x370   : > { %v2219_v60 = vpop.f32.mrf.mxu0 }
 0x371   : > { %v2539_v39 = vmax.f32 %v2507_v22, 0.0  ;;  %v2220_v63 = vadd.f32 %v2219_v60, %v2082_v10  ;;  %v2401_v0 = vpop.f32.mrf.mxu1 }
 0x373   : > { %2571 = vst [vmem:[%s4681_s11 + $0x90] sm:$0xff] %v2539_v39  ;;  %v2440_v1 = vadd.f32 %v2388_v16, %v2220_v63  ;;  %v2097_v33 = vpop.f32.mrf.mxu3 }
 0x375   : > { %v2476_v51 = vadd.f32 %v4668_v18, %v2440_v1  ;;  %v3359_v1 = vld [vmem:[%s3668_s16 + $0xd0] sm:$0xff] }
 0x377   : > { %v2508_v61 = vadd.f32 %v3352_v23, %v2476_v51 }
 0x378   : > { %v2222_v52 = vpop.f32.mrf.mxu0 }
 0x379   : > { %v2540_v5 = vmax.f32 %v2508_v61, 0.0  ;;  %v2223_v62 = vadd.f32 %v2222_v52, %v2085_v4  ;;  %v2403_v16 = vpop.f32.mrf.mxu1 }
 0x37b   : > { %2572 = vst [vmem:[%s4681_s11 + $0x98] sm:$0xff] %v2540_v5  ;;  %v2441_v21 = vadd.f32 %v2391_v47, %v2223_v62  ;;  %v2100_v4 = vpop.f32.mrf.mxu3 }
 0x37d   : > { %v2477_v54 = vadd.f32 %v4668_v18, %v2441_v21  ;;  %v3360_v21 = vld [vmem:[%s3668_s16 + $0xd8] sm:$0xff] }
 0x37f   : > { %v2509_v11 = vadd.f32 %v3353_v36, %v2477_v54 }
 0x380   : > { %v2224_v57 = vpop.f32.mrf.mxu0 }
 0x381   : > { %v2541_v56 = vmax.f32 %v2509_v11, 0.0  ;;  %v2225_v46 = vadd.f32 %v2224_v57, %v2087_v29  ;;  %v2406_v58 = vpop.f32.mrf.mxu1 }
 0x383   : > { %2573 = vst [vmem:[%s4681_s11 + $0xa0] sm:$0xff] %v2541_v56  ;;  %v2442_v48 = vadd.f32 %v2393_v17, %v2225_v46  ;;  %v2102_v2 = vpop.f32.mrf.mxu3 }
 0x385   : > { %v2478_v24 = vadd.f32 %v4668_v18, %v2442_v48  ;;  %v3361_v48 = vld [vmem:[%s3668_s16 + $0xe0] sm:$0xff] }
 0x387   : > { %v2510_v42 = vadd.f32 %v3354_v40, %v2478_v24 }
 0x388   : > { %v2227_v25 = vpop.f32.mrf.mxu0 }
 0x389   : > { %v2542_v43 = vmax.f32 %v2510_v42, 0.0  ;;  %v2228_v7 = vadd.f32 %v2227_v25, %v2090_v49  ;;  %v2408_v60 = vpop.f32.mrf.mxu1 }
 0x38b   : > { %2574 = vst [vmem:[%s4681_s11 + $0xa8] sm:$0xff] %v2542_v43  ;;  %v2443_v8 = vadd.f32 %v2396_v30, %v2228_v7  ;;  %v2105_v30 = vpop.f32.mrf.mxu3 }
 0x38d   : > { %v2479_v27 = vadd.f32 %v4668_v18, %v2443_v8  ;;  %v3362_v8 = vld [vmem:[%s3668_s16 + $0xe8] sm:$0xff] }
 0x38f   : > { %v2511_v15 = vadd.f32 %v3355_v50, %v2479_v27 }
 0x390   : > { %v2229_v13 = vpop.f32.mrf.mxu0 }
 0x391   : > { %v2543_v6 = vmax.f32 %v2511_v15, 0.0  ;;  %v2230_v10 = vadd.f32 %v2229_v13, %v2092_v3  ;;  %v2411_v5 = vpop.f32.mrf.mxu1 }
 0x393   : > { %2575 = vst [vmem:[%s4681_s11 + $0xb0] sm:$0xff] %v2543_v6  ;;  %v2444_v45 = vadd.f32 %v2398_v26, %v2230_v10  ;;  %v2107_v56 = vpop.f32.mrf.mxu3 }
 0x395   : > { %v2480_v55 = vadd.f32 %v4668_v18, %v2444_v45  ;;  %v3363_v45 = vld [vmem:[%s3668_s16 + $0xf0] sm:$0xff] }
 0x397   : > { %v2512_v12 = vadd.f32 %v3356_v34, %v2480_v55 }
 0x398   : > { %v2232_v35 = vpop.f32.mrf.mxu0 }
 0x399   : > { %v2544_v14 = vmax.f32 %v2512_v12, 0.0  ;;  %v2233_v38 = vadd.f32 %v2232_v35, %v2095_v44  ;;  %v2413_v26 = vpop.f32.mrf.mxu1 }
 0x39b   : > { %2576 = vst [vmem:[%s4681_s11 + $0xb8] sm:$0xff] %v2544_v14  ;;  %v2445_v31 = vadd.f32 %v2401_v0, %v2233_v38  ;;  %v2110_v44 = vpop.f32.mrf.mxu3 }
 0x39d   : > { %v2481_v9 = vadd.f32 %v4668_v18, %v2445_v31  ;;  %v3364_v31 = vld [vmem:[%s3668_s16 + $0xf8] sm:$0xff] }
 0x39f   : > { %v2513_v47 = vadd.f32 %v3357_v53, %v2481_v9 }
 0x3a0   : > { %v2234_v59 = vpop.f32.mrf.mxu0 }
 0x3a1   : > { %v2545_v32 = vmax.f32 %v2513_v47, 0.0  ;;  %v2235_v41 = vadd.f32 %v2234_v59, %v2097_v33  ;;  %v2416_v27 = vpop.f32.mrf.mxu1 }
 0x3a3   : > { %2577 = vst [vmem:[%s4681_s11 + $0xc0] sm:$0xff] %v2545_v32  ;;  %v2446_v28 = vadd.f32 %v2403_v16, %v2235_v41  ;;  %v2112_v55 = vpop.f32.mrf.mxu3 }
 0x3a5   : > { %v2482_v19 = vadd.f32 %v4668_v18, %v2446_v28 }
 0x3a7   : > { %v2514_v29 = vadd.f32 %v3358_v20, %v2482_v19 }
 0x3a8   : > { %v2237_v17 = vpop.f32.mrf.mxu0 }
 0x3a9   : > { %v2546_v37 = vmax.f32 %v2514_v29, 0.0  ;;  %v2238_v22 = vadd.f32 %v2237_v17, %v2100_v4  ;;  %v2418_v35 = vpop.f32.mrf.mxu1 }
 0x3ab   : > { %2578 = vst [vmem:[%s4681_s11 + $0xc8] sm:$0xff] %v2546_v37  ;;  %v2447_v39 = vadd.f32 %v2406_v58, %v2238_v22 }
 0x3ad   : > { %v2483_v63 = vadd.f32 %v4668_v18, %v2447_v39 }
 0x3af   : > { %v2515_v51 = vadd.f32 %v3359_v1, %v2483_v63 }
 0x3b0   : > { %v2239_v49 = vpop.f32.mrf.mxu0 }
 0x3b1   : > { %v2547_v23 = vmax.f32 %v2515_v51, 0.0  ;;  %v2240_v61 = vadd.f32 %v2239_v49, %v2102_v2 }
 0x3b3   : > { %2579 = vst [vmem:[%s4681_s11 + $0xd0] sm:$0xff] %v2547_v23  ;;  %v2448_v52 = vadd.f32 %v2408_v60, %v2240_v61 }
 0x3b5   : > { %v2484_v62 = vadd.f32 %v4668_v18, %v2448_v52 }
 0x3b7   : > { %v2516_v54 = vadd.f32 %v3360_v21, %v2484_v62 }
 0x3b8   : > { %v2242_v36 = vpop.f32.mrf.mxu0 }
 0x3b9   : > { %v2548_v11 = vmax.f32 %v2516_v54, 0.0  ;;  %v2243_v3 = vadd.f32 %v2242_v36, %v2105_v30 }
 0x3bb   : > { %2580 = vst [vmem:[%s4681_s11 + $0xd8] sm:$0xff] %v2548_v11  ;;  %v2449_v57 = vadd.f32 %v2411_v5, %v2243_v3 }
 0x3bd   : > { %v2485_v46 = vadd.f32 %v4668_v18, %v2449_v57 }
 0x3bf   : > { %v2517_v24 = vadd.f32 %v3361_v48, %v2485_v46 }
 0x3c0   : > { %v2244_v40 = vpop.f32.mrf.mxu0 }
 0x3c1   : > { %v2549_v42 = vmax.f32 %v2517_v24, 0.0  ;;  %v2245_v25 = vadd.f32 %v2244_v40, %v2107_v56 }
 0x3c3   : > { %2581 = vst [vmem:[%s4681_s11 + $0xe0] sm:$0xff] %v2549_v42  ;;  %v2450_v43 = vadd.f32 %v2413_v26, %v2245_v25 }
 0x3c5   : > { %v2486_v7 = vadd.f32 %v4668_v18, %v2450_v43 }
 0x3c7   : > { %v2518_v0 = vadd.f32 %v3362_v8, %v2486_v7 }
 0x3c8   : > { %v2247_v50 = vpop.f32.mrf.mxu0 }
 0x3c9   : > { %v2550_v15 = vmax.f32 %v2518_v0, 0.0  ;;  %v2248_v13 = vadd.f32 %v2247_v50, %v2110_v44 }
 0x3cb   : > { %2582 = vst [vmem:[%s4681_s11 + $0xe8] sm:$0xff] %v2550_v15  ;;  %v2451_v6 = vadd.f32 %v2416_v27, %v2248_v13 }
 0x3cd   : > { %v2487_v10 = vadd.f32 %v4668_v18, %v2451_v6 }
 0x3cf   : > { %v2519_v33 = vadd.f32 %v3363_v45, %v2487_v10 }
 0x3d0   : > { %v2249_v16 = vpop.f32.mrf.mxu0 }
 0x3d1   : > { %v2551_v34 = vmax.f32 %v2519_v33, 0.0  ;;  %v2250_v12 = vadd.f32 %v2249_v16, %v2112_v55 }
 0x3d3   : > { %2583 = vst [vmem:[%s4681_s11 + $0xf0] sm:$0xff] %v2551_v34  ;;  %v2452_v14 = vadd.f32 %v2418_v35, %v2250_v12 }
 0x3d5   : > { %v2488_v38 = vadd.f32 %v4668_v18, %v2452_v14 }
 0x3d7   : > { %v2520_v9 = vadd.f32 %v3364_v31, %v2488_v38 }
 0x3d9   : > { %v2552_v4 = vmax.f32 %v2520_v9, 0.0 }
 0x3db   : > { %2584 = vst [vmem:[%s4681_s11 + $0xf8] sm:$0xff] %v2552_v4 }
 0x3dc   : > { %3482 = shalt.err (!%p3479_p10)
}
 0x3dd   : > { %s3534_s8 = smov 128   ;;  %s3535_s16 = smov 8  }
 0x3de   : > { %3267 = dma.vmem_to_hbm [thread:$0]  (%p3632_p3), %s2599_s6, 4096, %s2601_s26, %s2586_s22, %s3534_s8, %s3534_s8, %s3535_s16  }
 0x3df PF: > { %s2615_s11 = sand.u32 1, %s3513_s18   ;;  %p5147_p12 = scmp.ge.s32.totalorder %s3525_s21, 2 }
 0x3e0   : > { %s2616_s12 = scalar_lea.sflag [#allocation4], %s2615_s11 }
 0x3e1   : > { %p3281_p13 = pnand %p5147_p12, %p3601_p6 }
 0x3e3   : > { %p3282_p0 = pneg %p3281_p13 }
 0x3e5   : > { %3508 = dma.done.wait (%p3282_p0), %s2616_s12, 4096  }
 0x3e6   : > { %3510 = vsyncadd (%p3282_p0), %s2616_s12, 4294963200  ;;  %p19_p5 = scmp.ge.s32.totalorder %s3622_s14, 4   ;;  %s5148_s18 = smov %s3517_s19 }
 0x3e7   : > { %s5149_s19 = smov %s3521_s20  ;;  %s5150_s20 = smov %s3638_s23 }
 0x3e8   : > { %s5151_s21 = smov %s3622_s14  ;;  %21 = sbr.rel (!%p19_p5) target bundleno = 6 (0x6), region = 93 }
 0x3ed   :  { %2622 = vsyncpa [#allocation3], 1 }
 0x3ee   :  { %2624 = vsyncpa [#allocation3 + $0x1], 1 }
 0x3ef   :  { %2625 = vsyncpa [#allocation6], 1 }
 0x3f0   :  { %2626 = vsyncpa [#allocation4], 1 }
 0x3f1   :  { %2628 = vsyncpa [#allocation4 + $0x1], 1 }

</bundles_post_ra>
